<compile_context>
chip_gen: v6e
topology: v6e:2x2x1
jax: 0.10.0
libtpu: 0.0.40
codegen_flags: <defaults>
</compile_context>

<pallas_src>
import functools

import jax
import jax.numpy as jnp
import numpy as np
from jax.experimental import pallas as pl
from jax.experimental.pallas import tpu as pltpu

# Shapes implied by the module: flatten to 224 = 112 * 2  =>  input length 50.
C_IN, L_IN = 28, 50
C1, K1 = 56, 5
C2, K2 = 112, 5
L1 = L_IN - K1 + 1            # 46  (conv1 output length)
P1 = (L1 - 4) // 4 + 1        # 11  (maxpool k=4, s=4, floor mode)
L2 = P1 - K2 + 1              # 7   (conv2 output length)
P2 = (L2 - 3) // 3 + 1        # 2   (maxpool k=3, s=3, floor mode)
FLAT = C2 * P2                # 224
NB_HIDDEN = 32
N_CLASSES = 2
N_OUT_PAD = 128               # lane-dense padded output width


def _round_up(n, m):
    return ((n + m - 1) // m) * m


def net_kernel(x_ref, w1_ref, b1_ref, w2_ref, b2_ref,
               wf1_ref, bf1_ref, wf2_ref, bf2_ref, out_ref,
               xcol1_ref, xcol2_ref):
    tb = x_ref.shape[1]
    zero_bf16 = jnp.bfloat16(0)
    x = x_ref[...]                                      # (L_IN, TB, C_IN) bf16

    # ---- conv1: fold the K1 taps into K via in-kernel im2col, ONE MXU dot ----
    # Shifted views are leading-axis slices; each lands at lane offset k*C_IN.
    for k in range(K1):
        xcol1_ref[:, :, k * C_IN:(k + 1) * C_IN] = x[k:k + L1]
    xf = xcol1_ref[...].reshape(L1 * tb, K1 * C_IN)     # (L1*TB, 140), free reshape
    h1 = jnp.dot(xf, w1_ref[...],
                 preferred_element_type=jnp.float32) + b1_ref[...]
    h1 = h1.astype(jnp.bfloat16).reshape(L1, tb, C1)    # (L1, TB, C1) bf16

    # ---- max_pool1d(kernel=4, stride=4, floor) + relu: leading-axis max tree ----
    g = h1[:P1 * 4].reshape(P1, 4, tb, C1)
    a1 = jnp.maximum(jnp.maximum(g[:, 0], g[:, 1]),
                     jnp.maximum(g[:, 2], g[:, 3]))
    a1 = jnp.maximum(a1, zero_bf16)                     # (P1, TB, C1) bf16

    # ---- conv2: same tap-fold, one K=280 dot ----
    for k in range(K2):
        xcol2_ref[:, :, k * C1:(k + 1) * C1] = a1[k:k + L2]
    af = xcol2_ref[...].reshape(L2 * tb, K2 * C1)       # (L2*TB, 280)
    h2 = jnp.dot(af, w2_ref[...],
                 preferred_element_type=jnp.float32) + b2_ref[...]
    h2 = h2.astype(jnp.bfloat16).reshape(L2, tb, C2)    # (L2, TB, C2) bf16

    # ---- max_pool1d(kernel=3, stride=3, floor) + relu ----
    a2_0 = jnp.maximum(jnp.maximum(jnp.maximum(h2[0], h2[1]), h2[2]), zero_bf16)
    a2_1 = jnp.maximum(jnp.maximum(jnp.maximum(h2[3], h2[4]), h2[5]), zero_bf16)

    # ---- fc1: torch's channel-major flatten folded into wf1 (P2, C2, H) ----
    h3 = (bf1_ref[...]
          + jnp.dot(a2_0, wf1_ref[0], preferred_element_type=jnp.float32)
          + jnp.dot(a2_1, wf1_ref[1], preferred_element_type=jnp.float32))
    h3 = jnp.maximum(h3, 0.0).astype(jnp.bfloat16)      # (TB, H)

    # ---- fc2: weight/bias padded to 128 lanes -> unmasked lane-dense store ----
    out = jnp.dot(h3, wf2_ref[...], preferred_element_type=jnp.float32)
    out_ref[...] = out + bf2_ref[...]                   # (TB, N_OUT_PAD)


def prepare_params(params):
    """One-time weight re-layout + bf16 cast (hoisted out of the forward pass)."""
    w1, b1, w2, b2, wf1, bf1, wf2, bf2 = params
    # im2col weights: row index = k*C + c, matching the lane layout built in-kernel.
    w1_2d = jnp.transpose(w1, (2, 1, 0)).reshape(K1 * C_IN, C1).astype(jnp.bfloat16)
    w2_2d = jnp.transpose(w2, (2, 1, 0)).reshape(K2 * C1, C2).astype(jnp.bfloat16)
    # torch .view(-1, 224) flattens channel-major (idx = c*P2 + t): fold that
    # permutation into fc1's weight so the kernel consumes time-major slices.
    wf1_k = jnp.transpose(wf1.reshape(NB_HIDDEN, C2, P2),
                          (2, 1, 0)).astype(jnp.bfloat16)          # (P2, C2, H)
    wf2_p = jnp.zeros((NB_HIDDEN, N_OUT_PAD), jnp.bfloat16)
    wf2_p = wf2_p.at[:, :N_CLASSES].set(wf2.T.astype(jnp.bfloat16))
    bf2_p = jnp.zeros((1, N_OUT_PAD), jnp.float32).at[:, :N_CLASSES].set(bf2)
    return (w1_2d, b1.reshape(1, C1).astype(jnp.float32),
            w2_2d, b2.reshape(1, C2).astype(jnp.float32),
            wf1_k, bf1.reshape(1, NB_HIDDEN).astype(jnp.float32),
            wf2_p, bf2_p)


@functools.partial(jax.jit, static_argnames=("tb",))
def net_forward(x_ncl, prep, *, tb=256):
    """x_ncl: (B, 28, 50) float32, PyTorch NCL layout.  Returns (B, 2) float32."""
    w1_2d, b1_k, w2_2d, b2_k, wf1_k, bf1_k, wf2_k, bf2_k = prep
    B = x_ncl.shape[0]
    tb = min(tb, _round_up(B, 8))      # don't over-pad tiny batches
    nblk = pl.cdiv(B, tb)
    b_pad = nblk * tb

    x = jnp.asarray(x_ncl, jnp.float32)
    if b_pad != B:
        x = jnp.pad(x, ((0, b_pad - B), (0, 0), (0, 0)))
    # Time-leading, channels-last layout for the kernel: (L_IN, B_pad, C_IN).
    x_lbc = jnp.transpose(x, (2, 0, 1)).astype(jnp.bfloat16)

    grid_spec = pltpu.PrefetchScalarGridSpec(
        num_scalar_prefetch=0,
        grid=(nblk,),
        in_specs=[
            pl.BlockSpec((L_IN, tb, C_IN), lambda i: (0, i, 0)),
            pl.BlockSpec((K1 * C_IN, C1), lambda i: (0, 0)),
            pl.BlockSpec((1, C1), lambda i: (0, 0)),
            pl.BlockSpec((K2 * C1, C2), lambda i: (0, 0)),
            pl.BlockSpec((1, C2), lambda i: (0, 0)),
            pl.BlockSpec((P2, C2, NB_HIDDEN), lambda i: (0, 0, 0)),
            pl.BlockSpec((1, NB_HIDDEN), lambda i: (0, 0)),
            pl.BlockSpec((NB_HIDDEN, N_OUT_PAD), lambda i: (0, 0)),
            pl.BlockSpec((1, N_OUT_PAD), lambda i: (0, 0)),
        ],
        out_specs=pl.BlockSpec((tb, N_OUT_PAD), lambda i: (i, 0)),
        scratch_shapes=[
            pltpu.VMEM((L1, tb, K1 * C_IN), jnp.bfloat16),   # conv1 im2col rows
            pltpu.VMEM((L2, tb, K2 * C1), jnp.bfloat16),     # conv2 im2col rows
        ],
    )

    out = pl.pallas_call(
        net_kernel,
        out_shape=jax.ShapeDtypeStruct((b_pad, N_OUT_PAD), jnp.float32),
        grid_spec=grid_spec,
        compiler_params=pltpu.CompilerParams(
            dimension_semantics=("parallel",),
            vmem_limit_bytes=56 * 1024 * 1024),
    )(x_lbc, w1_2d, b1_k, w2_2d, b2_k, wf1_k, bf1_k, wf2_k, bf2_k)
    return out[:B, :N_CLASSES]


def ref_forward(x_ncl, params):
    """Pure-JAX f32 reference reproducing the PyTorch forward (NCL layout)."""
    w1, b1, w2, b2, wf1, bf1, wf2, bf2 = params

    def conv1d(x, w, b):
        K = w.shape[2]
        Lout = x.shape[2] - K + 1
        out = jnp.zeros((x.shape[0], w.shape[0], Lout), jnp.float32)
        for k in range(K):
            out = out + jnp.einsum('bcl,oc->bol', x[:, :, k:k + Lout], w[:, :, k])
        return out + b[None, :, None]

    def maxpool(x, k):
        Lout = (x.shape[2] - k) // k + 1
        return jnp.max(x[:, :, :Lout * k].reshape(x.shape[0], x.shape[1], Lout, k),
                       axis=3)

    h = jax.nn.relu(maxpool(conv1d(x_ncl, w1, b1), 4))
    h = jax.nn.relu(maxpool(conv1d(h, w2, b2), 3))
    flat = h.reshape(h.shape[0], -1)            # channel-major == torch .view(-1, 224)
    h = jax.nn.relu(flat @ wf1.T + bf1)
    return h @ wf2.T + bf2


if __name__ == "__main__":
    B = 2
    key = jax.random.PRNGKey(0)
    ks = jax.random.split(key, 9)
    scale = jnp.float32(0.1)

    x = jax.random.normal(ks[0], (B, C_IN, L_IN), jnp.float32)
    # Deterministic synthetic parameters (PyTorch shape conventions).
    w1 = scale * jax.random.normal(ks[1], (C1, C_IN, K1), jnp.float32)
    b1 = scale * jax.random.normal(ks[2], (C1,), jnp.float32)
    w2 = scale * jax.random.normal(ks[3], (C2, C1, K2), jnp.float32)
    b2 = scale * jax.random.normal(ks[4], (C2,), jnp.float32)
    wf1 = scale * jax.random.normal(ks[5], (NB_HIDDEN, FLAT), jnp.float32)
    bf1 = scale * jax.random.normal(ks[6], (NB_HIDDEN,), jnp.float32)
    wf2 = scale * jax.random.normal(ks[7], (N_CLASSES, NB_HIDDEN), jnp.float32)
    bf2 = scale * jax.random.normal(ks[8], (N_CLASSES,), jnp.float32)
    params = (w1, b1, w2, b2, wf1, bf1, wf2, bf2)

    prep = jax.block_until_ready(prepare_params(params))   # one-time weight prep
    out = jax.block_until_ready(net_forward(x, prep))
    ref = jax.block_until_ready(ref_forward(x, params))

    assert out.shape == (B, N_CLASSES)
    np.testing.assert_allclose(np.asarray(out), np.asarray(ref), rtol=2e-2, atol=2e-2)
    print("KERNEL_OK")
</pallas_src>

<mosaic_0001>
module attributes {stable_mosaic.version = 11 : i64} {
  func.func @net_kernel(%arg0: i32, %arg1: memref<50x8x28xbf16, #tpu.memory_space<vmem>>, %arg2: memref<140x56xbf16, #tpu.memory_space<vmem>>, %arg3: memref<1x56xf32, #tpu.memory_space<vmem>>, %arg4: memref<280x112xbf16, #tpu.memory_space<vmem>>, %arg5: memref<1x112xf32, #tpu.memory_space<vmem>>, %arg6: memref<2x112x32xbf16, #tpu.memory_space<vmem>>, %arg7: memref<1x32xf32, #tpu.memory_space<vmem>>, %arg8: memref<32x128xbf16, #tpu.memory_space<vmem>>, %arg9: memref<1x128xf32, #tpu.memory_space<vmem>>, %arg10: memref<8x128xf32, #tpu.memory_space<vmem>>, %arg11: memref<46x8x140xbf16, #tpu.memory_space<vmem>>, %arg12: memref<7x8x280xbf16, #tpu.memory_space<vmem>>) attributes {dimension_semantics = [#tpu.dimension_semantics<parallel>], iteration_bounds = array<i64: 1>, scalar_prefetch = 0 : i64, scratch_operands = 2 : i64, tpu.core_type = #tpu.core_type<tc>, window_params = [{transform_indices = @transform_0, window_bounds = array<i64: 50, 8, 28>}, {pipeline_mode = #tpu.pipeline_mode<synchronous>, transform_indices = @transform_1, window_bounds = array<i64: 140, 56>}, {pipeline_mode = #tpu.pipeline_mode<synchronous>, transform_indices = @transform_2, window_bounds = array<i64: 1, 56>}, {pipeline_mode = #tpu.pipeline_mode<synchronous>, transform_indices = @transform_3, window_bounds = array<i64: 280, 112>}, {pipeline_mode = #tpu.pipeline_mode<synchronous>, transform_indices = @transform_4, window_bounds = array<i64: 1, 112>}, {pipeline_mode = #tpu.pipeline_mode<synchronous>, transform_indices = @transform_5, window_bounds = array<i64: 2, 112, 32>}, {pipeline_mode = #tpu.pipeline_mode<synchronous>, transform_indices = @transform_6, window_bounds = array<i64: 1, 32>}, {pipeline_mode = #tpu.pipeline_mode<synchronous>, transform_indices = @transform_7, window_bounds = array<i64: 32, 128>}, {pipeline_mode = #tpu.pipeline_mode<synchronous>, transform_indices = @transform_8, window_bounds = array<i64: 1, 128>}, {transform_indices = @transform_9, window_bounds = array<i64: 8, 128>}]} {
    %c0 = arith.constant 0 : index
    %c0_0 = arith.constant 0 : index
    %c0_1 = arith.constant 0 : index
    %0 = vector.load %arg1[%c0, %c0_0, %c0_1] : memref<50x8x28xbf16, #tpu.memory_space<vmem>>, vector<50x8x28xbf16>
    %1 = vector.extract_strided_slice %0 {offsets = [0, 0, 0], sizes = [46, 8, 28], strides = [1, 1, 1]} : vector<50x8x28xbf16> to vector<46x8x28xbf16>
    %c0_2 = arith.constant 0 : index
    %c0_3 = arith.constant 0 : index
    %c0_4 = arith.constant 0 : index
    %2 = vector.load %arg11[%c0_2, %c0_3, %c0_4] : memref<46x8x140xbf16, #tpu.memory_space<vmem>>, vector<46x8x28xbf16>
    tpu.vector_store %arg11[%c0_2, %c0_3, %c0_4], %1 {strides = array<i32>} : memref<46x8x140xbf16, #tpu.memory_space<vmem>>, vector<46x8x28xbf16>,
    %3 = vector.extract_strided_slice %0 {offsets = [1, 0, 0], sizes = [46, 8, 28], strides = [1, 1, 1]} : vector<50x8x28xbf16> to vector<46x8x28xbf16>
    %c0_5 = arith.constant 0 : index
    %c0_6 = arith.constant 0 : index
    %c28 = arith.constant 28 : index
    %4 = vector.load %arg11[%c0_5, %c0_6, %c28] : memref<46x8x140xbf16, #tpu.memory_space<vmem>>, vector<46x8x28xbf16>
    tpu.vector_store %arg11[%c0_5, %c0_6, %c28], %3 {strides = array<i32>} : memref<46x8x140xbf16, #tpu.memory_space<vmem>>, vector<46x8x28xbf16>,
    %5 = vector.extract_strided_slice %0 {offsets = [2, 0, 0], sizes = [46, 8, 28], strides = [1, 1, 1]} : vector<50x8x28xbf16> to vector<46x8x28xbf16>
    %c0_7 = arith.constant 0 : index
    %c0_8 = arith.constant 0 : index
    %c56 = arith.constant 56 : index
    %6 = vector.load %arg11[%c0_7, %c0_8, %c56] : memref<46x8x140xbf16, #tpu.memory_space<vmem>>, vector<46x8x28xbf16>
    tpu.vector_store %arg11[%c0_7, %c0_8, %c56], %5 {strides = array<i32>} : memref<46x8x140xbf16, #tpu.memory_space<vmem>>, vector<46x8x28xbf16>,
    %7 = vector.extract_strided_slice %0 {offsets = [3, 0, 0], sizes = [46, 8, 28], strides = [1, 1, 1]} : vector<50x8x28xbf16> to vector<46x8x28xbf16>
    %c0_9 = arith.constant 0 : index
    %c0_10 = arith.constant 0 : index
    %c84 = arith.constant 84 : index
    %8 = vector.load %arg11[%c0_9, %c0_10, %c84] : memref<46x8x140xbf16, #tpu.memory_space<vmem>>, vector<46x8x28xbf16>
    tpu.vector_store %arg11[%c0_9, %c0_10, %c84], %7 {strides = array<i32>} : memref<46x8x140xbf16, #tpu.memory_space<vmem>>, vector<46x8x28xbf16>,
    %9 = vector.extract_strided_slice %0 {offsets = [4, 0, 0], sizes = [46, 8, 28], strides = [1, 1, 1]} : vector<50x8x28xbf16> to vector<46x8x28xbf16>
    %c0_11 = arith.constant 0 : index
    %c0_12 = arith.constant 0 : index
    %c112 = arith.constant 112 : index
    %10 = vector.load %arg11[%c0_11, %c0_12, %c112] : memref<46x8x140xbf16, #tpu.memory_space<vmem>>, vector<46x8x28xbf16>
    tpu.vector_store %arg11[%c0_11, %c0_12, %c112], %9 {strides = array<i32>} : memref<46x8x140xbf16, #tpu.memory_space<vmem>>, vector<46x8x28xbf16>,
    %c0_13 = arith.constant 0 : index
    %c0_14 = arith.constant 0 : index
    %c0_15 = arith.constant 0 : index
    %11 = vector.load %arg11[%c0_13, %c0_14, %c0_15] : memref<46x8x140xbf16, #tpu.memory_space<vmem>>, vector<46x8x140xbf16>
    %12 = vector.shape_cast %11 : vector<46x8x140xbf16> to vector<368x140xbf16>
    %c0_16 = arith.constant 0 : index
    %c0_17 = arith.constant 0 : index
    %13 = vector.load %arg2[%c0_16, %c0_17] : memref<140x56xbf16, #tpu.memory_space<vmem>>, vector<140x56xbf16>
    %cst = arith.constant dense<0.000000e+00> : vector<368x56xf32>
    %14 = tpu.matmul %12, %13, %cst {dimension_numbers = #tpu.dot_dimension_numbers<[1], [0], [0], [1], [0, 0, 1, 1], [], []>} : vector<368x140xbf16>, vector<140x56xbf16>, vector<368x56xf32> -> vector<368x56xf32>
    %c0_18 = arith.constant 0 : index
    %c0_19 = arith.constant 0 : index
    %15 = vector.load %arg3[%c0_18, %c0_19] : memref<1x56xf32, #tpu.memory_space<vmem>>, vector<1x56xf32>
    %16 = vector.broadcast %15 : vector<1x56xf32> to vector<368x56xf32>
    %17 = arith.addf %14, %16 : vector<368x56xf32>
    %18 = arith.truncf %17 : vector<368x56xf32> to vector<368x56xbf16>
    %19 = vector.shape_cast %18 : vector<368x56xbf16> to vector<46x8x56xbf16>
    %20 = vector.extract_strided_slice %19 {offsets = [0, 0, 0], sizes = [44, 8, 56], strides = [1, 1, 1]} : vector<46x8x56xbf16> to vector<44x8x56xbf16>
    %21 = vector.shape_cast %20 : vector<44x8x56xbf16> to vector<11x4x8x56xbf16>
    %22 = vector.extract_strided_slice %21 {offsets = [0, 0, 0, 0], sizes = [11, 1, 8, 56], strides = [1, 1, 1, 1]} : vector<11x4x8x56xbf16> to vector<11x1x8x56xbf16>
    %23 = vector.shape_cast %22 : vector<11x1x8x56xbf16> to vector<11x8x56xbf16>
    %24 = vector.extract_strided_slice %21 {offsets = [0, 1, 0, 0], sizes = [11, 1, 8, 56], strides = [1, 1, 1, 1]} : vector<11x4x8x56xbf16> to vector<11x1x8x56xbf16>
    %25 = vector.shape_cast %24 : vector<11x1x8x56xbf16> to vector<11x8x56xbf16>
    %26 = arith.maximumf %23, %25 : vector<11x8x56xbf16>
    %27 = vector.extract_strided_slice %21 {offsets = [0, 2, 0, 0], sizes = [11, 1, 8, 56], strides = [1, 1, 1, 1]} : vector<11x4x8x56xbf16> to vector<11x1x8x56xbf16>
    %28 = vector.shape_cast %27 : vector<11x1x8x56xbf16> to vector<11x8x56xbf16>
    %29 = vector.extract_strided_slice %21 {offsets = [0, 3, 0, 0], sizes = [11, 1, 8, 56], strides = [1, 1, 1, 1]} : vector<11x4x8x56xbf16> to vector<11x1x8x56xbf16>
    %30 = vector.shape_cast %29 : vector<11x1x8x56xbf16> to vector<11x8x56xbf16>
    %31 = arith.maximumf %28, %30 : vector<11x8x56xbf16>
    %32 = arith.maximumf %26, %31 : vector<11x8x56xbf16>
    %cst_20 = arith.constant 0.000000e+00 : bf16
    %33 = vector.broadcast %cst_20 : bf16 to vector<11x8x56xbf16>
    %34 = arith.maximumf %32, %33 : vector<11x8x56xbf16>
    %35 = vector.extract_strided_slice %34 {offsets = [0, 0, 0], sizes = [7, 8, 56], strides = [1, 1, 1]} : vector<11x8x56xbf16> to vector<7x8x56xbf16>
    %c0_21 = arith.constant 0 : index
    %c0_22 = arith.constant 0 : index
    %c0_23 = arith.constant 0 : index
    %36 = vector.load %arg12[%c0_21, %c0_22, %c0_23] : memref<7x8x280xbf16, #tpu.memory_space<vmem>>, vector<7x8x56xbf16>
    tpu.vector_store %arg12[%c0_21, %c0_22, %c0_23], %35 {strides = array<i32>} : memref<7x8x280xbf16, #tpu.memory_space<vmem>>, vector<7x8x56xbf16>,
    %37 = vector.extract_strided_slice %34 {offsets = [1, 0, 0], sizes = [7, 8, 56], strides = [1, 1, 1]} : vector<11x8x56xbf16> to vector<7x8x56xbf16>
    %c0_24 = arith.constant 0 : index
    %c0_25 = arith.constant 0 : index
    %c56_26 = arith.constant 56 : index
    %38 = vector.load %arg12[%c0_24, %c0_25, %c56_26] : memref<7x8x280xbf16, #tpu.memory_space<vmem>>, vector<7x8x56xbf16>
    tpu.vector_store %arg12[%c0_24, %c0_25, %c56_26], %37 {strides = array<i32>} : memref<7x8x280xbf16, #tpu.memory_space<vmem>>, vector<7x8x56xbf16>,
    %39 = vector.extract_strided_slice %34 {offsets = [2, 0, 0], sizes = [7, 8, 56], strides = [1, 1, 1]} : vector<11x8x56xbf16> to vector<7x8x56xbf16>
    %c0_27 = arith.constant 0 : index
    %c0_28 = arith.constant 0 : index
    %c112_29 = arith.constant 112 : index
    %40 = vector.load %arg12[%c0_27, %c0_28, %c112_29] : memref<7x8x280xbf16, #tpu.memory_space<vmem>>, vector<7x8x56xbf16>
    tpu.vector_store %arg12[%c0_27, %c0_28, %c112_29], %39 {strides = array<i32>} : memref<7x8x280xbf16, #tpu.memory_space<vmem>>, vector<7x8x56xbf16>,
    %41 = vector.extract_strided_slice %34 {offsets = [3, 0, 0], sizes = [7, 8, 56], strides = [1, 1, 1]} : vector<11x8x56xbf16> to vector<7x8x56xbf16>
    %c0_30 = arith.constant 0 : index
    %c0_31 = arith.constant 0 : index
    %c168 = arith.constant 168 : index
    %42 = vector.load %arg12[%c0_30, %c0_31, %c168] : memref<7x8x280xbf16, #tpu.memory_space<vmem>>, vector<7x8x56xbf16>
    tpu.vector_store %arg12[%c0_30, %c0_31, %c168], %41 {strides = array<i32>} : memref<7x8x280xbf16, #tpu.memory_space<vmem>>, vector<7x8x56xbf16>,
    %43 = vector.extract_strided_slice %34 {offsets = [4, 0, 0], sizes = [7, 8, 56], strides = [1, 1, 1]} : vector<11x8x56xbf16> to vector<7x8x56xbf16>
    %c0_32 = arith.constant 0 : index
    %c0_33 = arith.constant 0 : index
    %c224 = arith.constant 224 : index
    %44 = vector.load %arg12[%c0_32, %c0_33, %c224] : memref<7x8x280xbf16, #tpu.memory_space<vmem>>, vector<7x8x56xbf16>
    tpu.vector_store %arg12[%c0_32, %c0_33, %c224], %43 {strides = array<i32>} : memref<7x8x280xbf16, #tpu.memory_space<vmem>>, vector<7x8x56xbf16>,
    %c0_34 = arith.constant 0 : index
    %c0_35 = arith.constant 0 : index
    %c0_36 = arith.constant 0 : index
    %45 = vector.load %arg12[%c0_34, %c0_35, %c0_36] : memref<7x8x280xbf16, #tpu.memory_space<vmem>>, vector<7x8x280xbf16>
    %46 = vector.shape_cast %45 : vector<7x8x280xbf16> to vector<56x280xbf16>
    %c0_37 = arith.constant 0 : index
    %c0_38 = arith.constant 0 : index
    %47 = vector.load %arg4[%c0_37, %c0_38] : memref<280x112xbf16, #tpu.memory_space<vmem>>, vector<280x112xbf16>
    %cst_39 = arith.constant dense<0.000000e+00> : vector<56x112xf32>
    %48 = tpu.matmul %46, %47, %cst_39 {dimension_numbers = #tpu.dot_dimension_numbers<[1], [0], [0], [1], [0, 0, 1, 1], [], []>} : vector<56x280xbf16>, vector<280x112xbf16>, vector<56x112xf32> -> vector<56x112xf32>
    %c0_40 = arith.constant 0 : index
    %c0_41 = arith.constant 0 : index
    %49 = vector.load %arg5[%c0_40, %c0_41] : memref<1x112xf32, #tpu.memory_space<vmem>>, vector<1x112xf32>
    %50 = vector.broadcast %49 : vector<1x112xf32> to vector<56x112xf32>
    %51 = arith.addf %48, %50 : vector<56x112xf32>
    %52 = arith.truncf %51 : vector<56x112xf32> to vector<56x112xbf16>
    %53 = vector.shape_cast %52 : vector<56x112xbf16> to vector<7x8x112xbf16>
    %54 = vector.extract_strided_slice %53 {offsets = [0, 0, 0], sizes = [1, 8, 112], strides = [1, 1, 1]} : vector<7x8x112xbf16> to vector<1x8x112xbf16>
    %55 = vector.shape_cast %54 : vector<1x8x112xbf16> to vector<8x112xbf16>
    %56 = vector.extract_strided_slice %53 {offsets = [1, 0, 0], sizes = [1, 8, 112], strides = [1, 1, 1]} : vector<7x8x112xbf16> to vector<1x8x112xbf16>
    %57 = vector.shape_cast %56 : vector<1x8x112xbf16> to vector<8x112xbf16>
    %58 = arith.maximumf %55, %57 : vector<8x112xbf16>
    %59 = vector.extract_strided_slice %53 {offsets = [2, 0, 0], sizes = [1, 8, 112], strides = [1, 1, 1]} : vector<7x8x112xbf16> to vector<1x8x112xbf16>
    %60 = vector.shape_cast %59 : vector<1x8x112xbf16> to vector<8x112xbf16>
    %61 = arith.maximumf %58, %60 : vector<8x112xbf16>
    %cst_42 = arith.constant 0.000000e+00 : bf16
    %62 = vector.broadcast %cst_42 : bf16 to vector<8x112xbf16>
    %63 = arith.maximumf %61, %62 : vector<8x112xbf16>
    %64 = vector.extract_strided_slice %53 {offsets = [3, 0, 0], sizes = [1, 8, 112], strides = [1, 1, 1]} : vector<7x8x112xbf16> to vector<1x8x112xbf16>
    %65 = vector.shape_cast %64 : vector<1x8x112xbf16> to vector<8x112xbf16>
    %66 = vector.extract_strided_slice %53 {offsets = [4, 0, 0], sizes = [1, 8, 112], strides = [1, 1, 1]} : vector<7x8x112xbf16> to vector<1x8x112xbf16>
    %67 = vector.shape_cast %66 : vector<1x8x112xbf16> to vector<8x112xbf16>
    %68 = arith.maximumf %65, %67 : vector<8x112xbf16>
    %69 = vector.extract_strided_slice %53 {offsets = [5, 0, 0], sizes = [1, 8, 112], strides = [1, 1, 1]} : vector<7x8x112xbf16> to vector<1x8x112xbf16>
    %70 = vector.shape_cast %69 : vector<1x8x112xbf16> to vector<8x112xbf16>
    %71 = arith.maximumf %68, %70 : vector<8x112xbf16>
    %cst_43 = arith.constant 0.000000e+00 : bf16
    %72 = vector.broadcast %cst_43 : bf16 to vector<8x112xbf16>
    %73 = arith.maximumf %71, %72 : vector<8x112xbf16>
    %c0_44 = arith.constant 0 : index
    %c0_45 = arith.constant 0 : index
    %74 = vector.load %arg7[%c0_44, %c0_45] : memref<1x32xf32, #tpu.memory_space<vmem>>, vector<1x32xf32>
    %c0_46 = arith.constant 0 : index
    %c0_47 = arith.constant 0 : index
    %c0_48 = arith.constant 0 : index
    %75 = vector.load %arg6[%c0_46, %c0_47, %c0_48] : memref<2x112x32xbf16, #tpu.memory_space<vmem>>, vector<1x112x32xbf16>
    %76 = vector.shape_cast %75 : vector<1x112x32xbf16> to vector<112x32xbf16>
    %cst_49 = arith.constant dense<0.000000e+00> : vector<8x32xf32>
    %77 = tpu.matmul %63, %76, %cst_49 {dimension_numbers = #tpu.dot_dimension_numbers<[1], [0], [0], [1], [0, 0, 1, 1], [], []>} : vector<8x112xbf16>, vector<112x32xbf16>, vector<8x32xf32> -> vector<8x32xf32>
    %78 = vector.broadcast %74 : vector<1x32xf32> to vector<8x32xf32>
    %79 = arith.addf %78, %77 : vector<8x32xf32>
    %c1 = arith.constant 1 : index
    %c0_50 = arith.constant 0 : index
    %c0_51 = arith.constant 0 : index
    %80 = vector.load %arg6[%c1, %c0_50, %c0_51] : memref<2x112x32xbf16, #tpu.memory_space<vmem>>, vector<1x112x32xbf16>
    %81 = vector.shape_cast %80 : vector<1x112x32xbf16> to vector<112x32xbf16>
    %cst_52 = arith.constant dense<0.000000e+00> : vector<8x32xf32>
    %82 = tpu.matmul %73, %81, %cst_52 {dimension_numbers = #tpu.dot_dimension_numbers<[1], [0], [0], [1], [0, 0, 1, 1], [], []>} : vector<8x112xbf16>, vector<112x32xbf16>, vector<8x32xf32> -> vector<8x32xf32>
    %83 = arith.addf %79, %82 : vector<8x32xf32>
    %cst_53 = arith.constant 0.000000e+00 : f32
    %84 = vector.broadcast %cst_53 : f32 to vector<8x32xf32>
    %85 = arith.maximumf %83, %84 : vector<8x32xf32>
    %86 = arith.truncf %85 : vector<8x32xf32> to vector<8x32xbf16>
    %c0_54 = arith.constant 0 : index
    %c0_55 = arith.constant 0 : index
    %87 = vector.load %arg8[%c0_54, %c0_55] : memref<32x128xbf16, #tpu.memory_space<vmem>>, vector<32x128xbf16>
    %cst_56 = arith.constant dense<0.000000e+00> : vector<8x128xf32>
    %88 = tpu.matmul %86, %87, %cst_56 {dimension_numbers = #tpu.dot_dimension_numbers<[1], [0], [0], [1], [0, 0, 1, 1], [], []>} : vector<8x32xbf16>, vector<32x128xbf16>, vector<8x128xf32> -> vector<8x128xf32>
    %c0_57 = arith.constant 0 : index
    %c0_58 = arith.constant 0 : index
    %89 = vector.load %arg9[%c0_57, %c0_58] : memref<1x128xf32, #tpu.memory_space<vmem>>, vector<1x128xf32>
    %90 = vector.broadcast %89 : vector<1x128xf32> to vector<8x128xf32>
    %91 = arith.addf %88, %90 : vector<8x128xf32>
    %c0_59 = arith.constant 0 : index
    %c0_60 = arith.constant 0 : index
    %92 = vector.load %arg10[%c0_59, %c0_60] : memref<8x128xf32, #tpu.memory_space<vmem>>, vector<8x128xf32>
    tpu.vector_store %arg10[%c0_59, %c0_60], %91 {strides = array<i32>} : memref<8x128xf32, #tpu.memory_space<vmem>>, vector<8x128xf32>,
    return
  }
  func.func @transform_0(%arg0: i32) -> (i32, i32, i32) {
    %c0_i32 = arith.constant 0 : i32
    %c0_i32_0 = arith.constant 0 : i32
    %c0_i32_1 = arith.constant 0 : i32
    return %c0_i32, %arg0, %c0_i32_0 : i32, i32, i32
  }
  func.func @transform_1(%arg0: i32) -> (i32, i32) {
    %c0_i32 = arith.constant 0 : i32
    %c0_i32_0 = arith.constant 0 : i32
    %c0_i32_1 = arith.constant 0 : i32
    return %c0_i32, %c0_i32_0 : i32, i32
  }
  func.func @transform_2(%arg0: i32) -> (i32, i32) {
    %c0_i32 = arith.constant 0 : i32
    %c0_i32_0 = arith.constant 0 : i32
    %c0_i32_1 = arith.constant 0 : i32
    return %c0_i32, %c0_i32_0 : i32, i32
  }
  func.func @transform_3(%arg0: i32) -> (i32, i32) {
    %c0_i32 = arith.constant 0 : i32
    %c0_i32_0 = arith.constant 0 : i32
    %c0_i32_1 = arith.constant 0 : i32
    return %c0_i32, %c0_i32_0 : i32, i32
  }
  func.func @transform_4(%arg0: i32) -> (i32, i32) {
    %c0_i32 = arith.constant 0 : i32
    %c0_i32_0 = arith.constant 0 : i32
    %c0_i32_1 = arith.constant 0 : i32
    return %c0_i32, %c0_i32_0 : i32, i32
  }
  func.func @transform_5(%arg0: i32) -> (i32, i32, i32) {
    %c0_i32 = arith.constant 0 : i32
    %c0_i32_0 = arith.constant 0 : i32
    %c0_i32_1 = arith.constant 0 : i32
    %c0_i32_2 = arith.constant 0 : i32
    return %c0_i32, %c0_i32_0, %c0_i32_1 : i32, i32, i32
  }
  func.func @transform_6(%arg0: i32) -> (i32, i32) {
    %c0_i32 = arith.constant 0 : i32
    %c0_i32_0 = arith.constant 0 : i32
    %c0_i32_1 = arith.constant 0 : i32
    return %c0_i32, %c0_i32_0 : i32, i32
  }
  func.func @transform_7(%arg0: i32) -> (i32, i32) {
    %c0_i32 = arith.constant 0 : i32
    %c0_i32_0 = arith.constant 0 : i32
    %c0_i32_1 = arith.constant 0 : i32
    return %c0_i32, %c0_i32_0 : i32, i32
  }
  func.func @transform_8(%arg0: i32) -> (i32, i32) {
    %c0_i32 = arith.constant 0 : i32
    %c0_i32_0 = arith.constant 0 : i32
    %c0_i32_1 = arith.constant 0 : i32
    return %c0_i32, %c0_i32_0 : i32, i32
  }
  func.func @transform_9(%arg0: i32) -> (i32, i32) {
    %c0_i32 = arith.constant 0 : i32
    %c0_i32_0 = arith.constant 0 : i32
    return %arg0, %c0_i32 : i32, i32
  }
}

</mosaic_0001>

<bundles_post_ra>
// kernel: net_forward.1
= control target key start
LH: loop header
LB: loop body
LE: loop exit
PB: predicated region body
PF: predicated region fallthrough
CT: control target
= control target key end

     0   :  { %vm83_vm0 = vcmask 224256   ;;  %v3217_v3 = vmov 0   ;;  %s3218_s15 = smov 112   ;;  %s3219_s16 = smov 28   ;;  %vm1415_vm1 = vcmask 1045504   ;;  %vm314_vm2 = vcmask 453856   ;;  %s4621_s0 = inlined_call_operand.vmem [shape: bf16[50,8,28], index: 0, kind: input, shape index: {}]   ;;  %s4622_s1 = inlined_call_operand.vmem [shape: bf16[140,56], index: 1, kind: input, shape index: {}]   ;;  %s4623_s2 = inlined_call_operand.vmem [shape: f32[1,56], index: 2, kind: input, shape index: {}]   ;;  %s4624_s3 = inlined_call_operand.vmem [shape: bf16[280,112], index: 3, kind: input, shape index: {}]   ;;  %s4625_s5 = inlined_call_operand.vmem [shape: bf16[2,112,32], index: 5, kind: input, shape index: {}]   ;;  %s4626_s4 = inlined_call_operand.vmem [shape: f32[1,112], index: 4, kind: input, shape index: {}]   ;;  %s4627_s7 = inlined_call_operand.vmem [shape: bf16[32,128], index: 7, kind: input, shape index: {}]   ;;  %s4628_s6 = inlined_call_operand.vmem [shape: f32[1,32], index: 6, kind: input, shape index: {}]   ;;  %s4629_s8 = inlined_call_operand.vmem [shape: f32[1,128], index: 8, kind: input, shape index: {}]   ;;  %s4630_s9 = inlined_call_operand.vmem [shape: f32[8,128], index: 9, kind: output, shape index: {}]  }
   0x1   :  { %v3279_v0 = vld [vmem:[%s4621_s0 + $0x10] sm:$0xf]  ;;  %v34_v1 = vld [vmem:[%s4621_s0 + $0x4] sm:$0xf]  ;;  %v3287_v2 = vld [vmem:[%s4621_s0 + $0x14] sm:$0xf]  ;;  %1419 = vmatprep.subr.bf16.mxu0 %v3217_v3  ;;  %3062 = vmatprep.subr.bf16.mxu1 %v3217_v3 }
   0x2   :  { %734 = vrot.lane.b32.xlu1 %v3279_v0, %s3218_s15  ;;  %176 = vrot.lane.b32.xlu0 %v34_v1, %s3219_s16  ;;  %85 = vst.msk [vmem:[#allocation2 + $0x8] sm:$0xf] %vm83_vm0, %v34_v1  ;;  %88 = vst.msk [vmem:[#allocation2 + $0x20] sm:$0xf] %vm83_vm0, %v3279_v0  ;;  %v35_v4 = vld [vmem:[%s4621_s0 + $0x8] sm:$0xf] }
   0x3   :  { %89 = vst.msk [vmem:[#allocation2 + $0x28] sm:$0xf] %vm83_vm0, %v3287_v2  ;;  %v36_v5 = vld [vmem:[%s4621_s0 + $0xc] sm:$0xf]  ;;  %86 = vst.msk [vmem:[#allocation2 + $0x10] sm:$0xf] %vm83_vm0, %v35_v4 }
   0x4   :  { %87 = vst.msk [vmem:[#allocation2 + $0x18] sm:$0xf] %vm83_vm0, %v36_v5  ;;  %v3310_v6 = vld [vmem:[%s4621_s0 + $0x1c] sm:$0xf]  ;;  %v3315_v7 = vld [vmem:[%s4621_s0 + $0x18] sm:$0xf] }
   0x5   :  { %v3320_v8 = vld [vmem:[%s4621_s0 + $0x24] sm:$0xf]  ;;  %91 = vst.msk [vmem:[#allocation2 + $0x38] sm:$0xf] %vm83_vm0, %v3310_v6  ;;  %90 = vst.msk [vmem:[#allocation2 + $0x30] sm:$0xf] %vm83_vm0, %v3315_v7 }
   0x6   :  { %93 = vst.msk [vmem:[#allocation2 + $0x48] sm:$0xf] %vm83_vm0, %v3320_v8  ;;  %v3331_v9 = vld [vmem:[%s4621_s0 + $0x20] sm:$0xf]  ;;  %v3336_v10 = vld [vmem:[%s4621_s0 + $0x2c] sm:$0xf]  ;;  %736 = vrot.lane.b32.xlu1 %v3287_v2, %s3218_s15  ;;  %178 = vrot.lane.b32.xlu0 %v35_v4, %s3219_s16 }
   0x7   :  { %v3341_v11 = vld [vmem:[%s4621_s0 + $0x28] sm:$0xf]  ;;  %92 = vst.msk [vmem:[#allocation2 + $0x40] sm:$0xf] %vm83_vm0, %v3331_v9  ;;  %95 = vst.msk [vmem:[#allocation2 + $0x58] sm:$0xf] %vm83_vm0, %v3336_v10 }
   0x8   :  { %94 = vst.msk [vmem:[#allocation2 + $0x50] sm:$0xf] %vm83_vm0, %v3341_v11  ;;  %v3352_v12 = vld [vmem:[%s4621_s0 + $0x34] sm:$0xf]  ;;  %v3357_v13 = vld [vmem:[%s4621_s0 + $0x30] sm:$0xf] }
   0x9   :  { %v3362_v14 = vld [vmem:[%s4621_s0 + $0x3c] sm:$0xf]  ;;  %97 = vst.msk [vmem:[#allocation2 + $0x68] sm:$0xf] %vm83_vm0, %v3352_v12  ;;  %96 = vst.msk [vmem:[#allocation2 + $0x60] sm:$0xf] %vm83_vm0, %v3357_v13 }
   0xa   :  { %99 = vst.msk [vmem:[#allocation2 + $0x78] sm:$0xf] %vm83_vm0, %v3362_v14  ;;  %v3376_v15 = vld [vmem:[%s4621_s0 + $0x38] sm:$0xf]  ;;  %v3381_v16 = vld [vmem:[%s4621_s0 + $0x44] sm:$0xf] }
   0xb   :  { %98 = vst.msk [vmem:[#allocation2 + $0x70] sm:$0xf] %vm83_vm0, %v3376_v15  ;;  %101 = vst.msk [vmem:[#allocation2 + $0x88] sm:$0xf] %vm83_vm0, %v3381_v16  ;;  %v3390_v17 = vld [vmem:[%s4621_s0 + $0x40] sm:$0xf] }
   0xc   :  { %100 = vst.msk [vmem:[#allocation2 + $0x80] sm:$0xf] %vm83_vm0, %v3390_v17  ;;  %v3090_v18 = vld [vmem:[%s4622_s1 + $0x38] sm:$0xff]   ;;  %s3220_s28 = smov 56   ;;  %v33_v19 = vld [vmem:[%s4621_s0] sm:$0xf] }
   0xd   :  { %364 = vrot.lane.b32.xlu1 %v36_v5, %s3220_s28  ;;  %362 = vrot.lane.b32.xlu0 %v35_v4, %s3220_s28  ;;  %v3091_v20 = vld [vmem:[%s4622_s1 + $0x30] sm:$0xff]   ;;  %84 = vst.msk [vmem:[#allocation2] sm:$0xf] %vm83_vm0, %v33_v19  ;;  %v3410_v21 = vld [vmem:[%s4621_s0 + $0x4c] sm:$0xf]  ;;  %s3221_s18 = smov 84  }
   0xe   :  { %1420 = vmatpush1.bf16.msra.mxu0 %v3090_v18  ;;  %3071 = vmatpush1.bf16.msra.mxu1 %v3090_v18  ;;  %v3415_v22 = vld [vmem:[%s4621_s0 + $0x48] sm:$0xf]  ;;  %103 = vst.msk [vmem:[#allocation2 + $0x98] sm:$0xf] %vm83_vm0, %v3410_v21  ;;  %v3433_v24 = vld [vmem:[%s4621_s0 + $0x54] sm:$0xf] }
   0xf   :  { %1421 = vmatprep.subr.bf16.mxu0 %v3217_v3  ;;  %3063 = vmatprep.subr.bf16.mxu1 %v3217_v3  ;;  %102 = vst.msk [vmem:[#allocation2 + $0x90] sm:$0xf] %vm83_vm0, %v3415_v22  ;;  %v3092_v23 = vld [vmem:[%s4622_s1 + $0x28] sm:$0xff]   ;;  %v3438_v25 = vld [vmem:[%s4621_s0 + $0x50] sm:$0xf]  ;;  %v3093_v26 = vld [vmem:[%s4622_s1 + $0x20] sm:$0xff]  }
  0x10   :  { %105 = vst.msk [vmem:[#allocation2 + $0xa8] sm:$0xf] %vm83_vm0, %v3433_v24  ;;  %104 = vst.msk [vmem:[#allocation2 + $0xa0] sm:$0xf] %vm83_vm0, %v3438_v25  ;;  %v3455_v27 = vld [vmem:[%s4621_s0 + $0x5c] sm:$0xf] }
  0x11   :  { %550 = vrot.lane.b32.xlu1 %v3279_v0, %s3221_s18  ;;  %548 = vrot.lane.b32.xlu0 %v36_v5, %s3221_s18  ;;  %107 = vst.msk [vmem:[#allocation2 + $0xb8] sm:$0xf] %vm83_vm0, %v3455_v27  ;;  %v3466_v28 = vld [vmem:[%s4621_s0 + $0x58] sm:$0xf]  ;;  %v3095_v30 = vld [vmem:[%s4622_s1 + $0x10] sm:$0xff]   ;;  %vm500_vm3 = vcmask 683456  }
  0x12   :  { %1422 = vmatpush1.bf16.msra.mxu0 %v3091_v20  ;;  %3072 = vmatpush1.bf16.msra.mxu1 %v3091_v20  ;;  %v3094_v29 = vld [vmem:[%s4622_s1 + $0x18] sm:$0xff]   ;;  %106 = vst.msk [vmem:[#allocation2 + $0xb0] sm:$0xf] %vm83_vm0, %v3466_v28  ;;  %v3096_v31 = vld [vmem:[%s4622_s1 + $0x8] sm:$0xff]   ;;  %v3097_v32 = vld [vmem:[%s4622_s1] sm:$0xff]   ;;  %vm965_vm4 = vcmask 1044352  }
  0x13   :  { %1423 = vmatprep.subr.bf16.mxu0 %v3217_v3  ;;  %3064 = vmatprep.subr.bf16.mxu1 %v3217_v3  ;;  %v3098_v33 = vld [vmem:[%s4622_s1 + $0x40] sm:$0x3f]   ;;  %v3540_v37 = vld [vmem:[%s4621_s0 + $0x6c] sm:$0xf]  ;;  %v3551_v38 = vld [vmem:[%s4621_s0 + $0x68] sm:$0xf] }
  0x14   :  { %v3508_v34 = vld [vmem:[%s4621_s0 + $0x64] sm:$0xf]  ;;  %v3519_v35 = vld [vmem:[%s4621_s0 + $0x60] sm:$0xf]  ;;  %v1417_v36 = vsel %vm1415_vm1, %v3098_v33, 0  ;;  %vm966_vm5 = vcmask 97284  }
  0x15   :  { %182 = vrot.lane.b32.xlu1 %v3279_v0, %s3219_s16  ;;  %180 = vrot.lane.b32.xlu0 %v36_v5, %s3219_s16  ;;  %109 = vst.msk [vmem:[#allocation2 + $0xc8] sm:$0xf] %vm83_vm0, %v3508_v34  ;;  %108 = vst.msk [vmem:[#allocation2 + $0xc0] sm:$0xf] %vm83_vm0, %v3519_v35  ;;  %v3570_v39 = vld [vmem:[%s4621_s0 + $0x74] sm:$0xf] }
  0x16   :  { %1424 = vmatpush1.bf16.msra.mxu0 %v3092_v23  ;;  %3073 = vmatpush1.bf16.msra.mxu1 %v3092_v23  ;;  %111 = vst.msk [vmem:[#allocation2 + $0xd8] sm:$0xf] %vm83_vm0, %v3540_v37  ;;  %110 = vst.msk [vmem:[#allocation2 + $0xd0] sm:$0xf] %vm83_vm0, %v3551_v38  ;;  %v3581_v40 = vld [vmem:[%s4621_s0 + $0x70] sm:$0xf] }
  0x17   :  { %1425 = vmatprep.subr.bf16.mxu0 %v3217_v3  ;;  %3065 = vmatprep.subr.bf16.mxu1 %v3217_v3  ;;  %113 = vst.msk [vmem:[#allocation2 + $0xe8] sm:$0xf] %vm83_vm0, %v3570_v39  ;;  %112 = vst.msk [vmem:[#allocation2 + $0xe0] sm:$0xf] %vm83_vm0, %v3581_v40  ;;  %v3600_v41 = vld [vmem:[%s4621_s0 + $0x7c] sm:$0xf] }
  0x18   :  { %115 = vst.msk [vmem:[#allocation2 + $0xf8] sm:$0xf] %vm83_vm0, %v3600_v41  ;;  %v3611_v42 = vld [vmem:[%s4621_s0 + $0x78] sm:$0xf]  ;;  %v3630_v43 = vld [vmem:[%s4621_s0 + $0x84] sm:$0xf]  ;;  %vm3714_vm8 = vmor %vm966_vm5, %vm965_vm4 }
  0x19   :  { %740 = vrot.lane.b32.xlu1 %v3310_v6, %s3218_s15  ;;  %738 = vrot.lane.b32.xlu0 %v3315_v7, %s3218_s15  ;;  %114 = vst.msk [vmem:[#allocation2 + $0xf0] sm:$0xf] %vm83_vm0, %v3611_v42  ;;  %117 = vst.msk [vmem:[#allocation2 + $0x108] sm:$0xf] %vm83_vm0, %v3630_v43  ;;  %v3641_v44 = vld [vmem:[%s4621_s0 + $0x80] sm:$0xf] }
  0x1a   :  { %1426 = vmatpush1.bf16.msra.mxu0 %v3093_v26  ;;  %3074 = vmatpush1.bf16.msra.mxu1 %v3093_v26  ;;  %116 = vst.msk [vmem:[#allocation2 + $0x100] sm:$0xf] %vm83_vm0, %v3641_v44  ;;  %v3661_v47 = vld [vmem:[%s4621_s0 + $0x98] sm:$0xf]  ;;  %v3672_v48 = vld [vmem:[%s4621_s0 + $0x94] sm:$0xf] }
  0x1b   :  { %1427 = vmatprep.subr.bf16.mxu0 %v3217_v3  ;;  %3066 = vmatprep.subr.bf16.mxu1 %v3217_v3  ;;  %122 = vst.msk [vmem:[#allocation2 + $0x130] sm:$0xf] %vm83_vm0, %v3661_v47  ;;  %121 = vst.msk [vmem:[#allocation2 + $0x128] sm:$0xf] %vm83_vm0, %v3672_v48  ;;  %v3684_v51 = vld [vmem:[%s4621_s0 + $0x8c] sm:$0xf] }
  0x1c   :  { %v3689_v52 = vld [vmem:[%s4621_s0 + $0x88] sm:$0xf]  ;;  %119 = vst.msk [vmem:[#allocation2 + $0x118] sm:$0xf] %vm83_vm0, %v3684_v51  ;;  %v3700_v57 = vld [vmem:[%s4621_s0 + $0xa4] sm:$0xf] }
  0x1d   :  { %368 = vrot.lane.b32.xlu1 %v3287_v2, %s3220_s28  ;;  %366 = vrot.lane.b32.xlu0 %v3279_v0, %s3220_s28  ;;  %118 = vst.msk [vmem:[#allocation2 + $0x110] sm:$0xf] %vm83_vm0, %v3689_v52  ;;  %vm872_vm6 = vcmask 916480   ;;  %vm686_vm7 = vcmask 913056   ;;  %125 = vst.msk [vmem:[#allocation2 + $0x148] sm:$0xf] %vm83_vm0, %v3700_v57 }
  0x1e   :  { %1428 = vmatpush1.bf16.msra.mxu0 %v3094_v29  ;;  %3075 = vmatpush1.bf16.msra.mxu1 %v3094_v29  ;;  %v3711_v58 = vld [vmem:[%s4621_s0 + $0xa0] sm:$0xf]  ;;  %vm1345_vm9 = vcmask 97280   ;;  %vm1854_vm10 = vcmask 453632   ;;  %s3223_s24 = smov 96   ;;  %v3165_v59 = vld [vmem:[%s4624_s3 + $0x38] sm:$0xff]  }
  0x1f   :  { %1429 = vmatprep.subr.bf16.mxu0 %v3217_v3  ;;  %3067 = vmatprep.subr.bf16.mxu1 %v3217_v3  ;;  %124 = vst.msk [vmem:[#allocation2 + $0x140] sm:$0xf] %vm83_vm0, %v3711_v58  ;;  %vm1890_vm11 = vcmask 912832   ;;  %vm1934_vm12 = vcmask 326660   ;;  %vm1965_vm14 = vcmask 781632   ;;  %vm2010_vm15 = vcmask 1044224  }
  0x20   :  { %vm4417_vm13 = vmor %vm1934_vm12, %vm965_vm4  ;;  %vm1995_vm1 = vcmask 785408   ;;  %vm2236_vm4 = vcmask 195584   ;;  %vm3225_vm5 = vmmov 0  }
  0x21   :  { %554 = vrot.lane.b32.xlu1 %v3315_v7, %s3221_s18  ;;  %552 = vrot.lane.b32.xlu0 %v3287_v2, %s3221_s18 }
  0x22   :  { %1430 = vmatpush1.bf16.msra.mxu0 %v3095_v30  ;;  %3076 = vmatpush1.bf16.msra.mxu1 %v3095_v30 }
  0x23   :  { %1431 = vmatprep.subr.bf16.mxu0 %v3217_v3  ;;  %3068 = vmatprep.subr.bf16.mxu1 %v3217_v3 }
  0x25   :  { %186 = vrot.lane.b32.xlu1 %v3315_v7, %s3219_s16  ;;  %184 = vrot.lane.b32.xlu0 %v3287_v2, %s3219_s16  ;;  %v3737_v2 = vld [vmem:[%s4621_s0 + $0x9c] sm:$0xf] }
  0x26   :  { %1432 = vmatpush1.bf16.msra.mxu0 %v3096_v31  ;;  %3077 = vmatpush1.bf16.msra.mxu1 %v3096_v31  ;;  %123 = vst.msk [vmem:[#allocation2 + $0x138] sm:$0xf] %vm83_vm0, %v3737_v2  ;;  %v3802_v31 = vld [vmem:[%s4621_s0 + $0xa8] sm:$0xf] }
  0x27   :  { %1433 = vmatprep.subr.bf16.mxu0 %v3217_v3  ;;  %3069 = vmatprep.subr.bf16.mxu1 %v3217_v3  ;;  %126 = vst.msk [vmem:[#allocation2 + $0x150] sm:$0xf] %vm83_vm0, %v3802_v31 }
  0x29   :  { %744 = vrot.lane.b32.xlu1 %v3320_v8, %s3218_s15  ;;  %742 = vrot.lane.b32.xlu0 %v3331_v9, %s3218_s15 }
  0x2a   :  { %1434 = vmatpush1.bf16.msra.mxu0 %v3097_v32  ;;  %3078 = vmatpush1.bf16.msra.mxu1 %v3097_v32 }
  0x2b   :  { %1449 = vmatprep.subr.bf16.mxu0 %v3217_v3  ;;  %3070 = vmatprep.subr.bf16.mxu1 %v3217_v3 }
  0x2d   :  { %372 = vrot.lane.b32.xlu1 %v3310_v6, %s3220_s28  ;;  %370 = vrot.lane.b32.xlu0 %v3315_v7, %s3220_s28 }
  0x2e   :  { %1450 = vmatpush2.bf16.msra.mxu0 %v1417_v36  ;;  %3079 = vmatpush2.bf16.msra.mxu1 %v1417_v36 }
  0x31   :  { %558 = vrot.lane.b32.xlu1 %v3331_v9, %s3221_s18  ;;  %556 = vrot.lane.b32.xlu0 %v3310_v6, %s3221_s18 }
  0x35   :  { %190 = vrot.lane.b32.xlu1 %v3331_v9, %s3219_s16  ;;  %188 = vrot.lane.b32.xlu0 %v3310_v6, %s3219_s16 }
  0x39   :  { %748 = vrot.lane.b32.xlu1 %v3336_v10, %s3218_s15  ;;  %746 = vrot.lane.b32.xlu0 %v3341_v11, %s3218_s15 }
  0x3d   :  { %376 = vrot.lane.b32.xlu1 %v3320_v8, %s3220_s28  ;;  %374 = vrot.lane.b32.xlu0 %v3331_v9, %s3220_s28 }
  0x41   :  { %562 = vrot.lane.b32.xlu1 %v3341_v11, %s3221_s18  ;;  %560 = vrot.lane.b32.xlu0 %v3320_v8, %s3221_s18 }
  0x45   :  { %194 = vrot.lane.b32.xlu1 %v3341_v11, %s3219_s16  ;;  %192 = vrot.lane.b32.xlu0 %v3320_v8, %s3219_s16 }
  0x49   :  { %752 = vrot.lane.b32.xlu1 %v3352_v12, %s3218_s15  ;;  %750 = vrot.lane.b32.xlu0 %v3357_v13, %s3218_s15 }
  0x4d   :  { %380 = vrot.lane.b32.xlu1 %v3336_v10, %s3220_s28  ;;  %378 = vrot.lane.b32.xlu0 %v3341_v11, %s3220_s28 }
  0x51   :  { %566 = vrot.lane.b32.xlu1 %v3357_v13, %s3221_s18  ;;  %564 = vrot.lane.b32.xlu0 %v3336_v10, %s3221_s18 }
  0x55   :  { %198 = vrot.lane.b32.xlu1 %v3357_v13, %s3219_s16  ;;  %196 = vrot.lane.b32.xlu0 %v3336_v10, %s3219_s16 }
  0x59   :  { %756 = vrot.lane.b32.xlu1 %v3362_v14, %s3218_s15  ;;  %754 = vrot.lane.b32.xlu0 %v3376_v15, %s3218_s15 }
  0x5d   :  { %384 = vrot.lane.b32.xlu1 %v3352_v12, %s3220_s28  ;;  %382 = vrot.lane.b32.xlu0 %v3357_v13, %s3220_s28 }
  0x61   :  { %570 = vrot.lane.b32.xlu1 %v3376_v15, %s3221_s18  ;;  %568 = vrot.lane.b32.xlu0 %v3352_v12, %s3221_s18 }
  0x65   :  { %202 = vrot.lane.b32.xlu1 %v3376_v15, %s3219_s16  ;;  %200 = vrot.lane.b32.xlu0 %v3352_v12, %s3219_s16 }
  0x69   :  { %760 = vrot.lane.b32.xlu1 %v3381_v16, %s3218_s15  ;;  %758 = vrot.lane.b32.xlu0 %v3390_v17, %s3218_s15 }
  0x6d   :  { %388 = vrot.lane.b32.xlu1 %v3362_v14, %s3220_s28  ;;  %386 = vrot.lane.b32.xlu0 %v3376_v15, %s3220_s28 }
  0x71   :  { %574 = vrot.lane.b32.xlu1 %v3390_v17, %s3221_s18  ;;  %572 = vrot.lane.b32.xlu0 %v3362_v14, %s3221_s18 }
  0x74   :  { %v735_v45 = vpop.permute.xlu1 %734  ;;  %v177_v46 = vpop.permute.xlu0 %176 }
  0x75   :  { %206 = vrot.lane.b32.xlu1 %v3390_v17, %s3219_s16  ;;  %204 = vrot.lane.b32.xlu0 %v3362_v14, %s3219_s16  ;;  %315 = vst.msk [vmem:[#allocation2] sm:$0xf] %vm314_vm2, %v177_v46  ;;  %v826_v55 = vrot.slane %v735_v45, 4 }
  0x77   :  { %v873_v62 = vsel %vm872_vm6, %v826_v55, %v735_v45 }
  0x78   :  { %v737_v49 = vpop.permute.xlu1 %736  ;;  %v179_v50 = vpop.permute.xlu0 %178 }
  0x79   :  { %764 = vrot.lane.b32.xlu1 %v3410_v21, %s3218_s15  ;;  %762 = vrot.lane.b32.xlu0 %v3415_v22, %s3218_s15  ;;  %316 = vst.msk [vmem:[#allocation2 + $0x8] sm:$0xf] %vm314_vm2, %v179_v50  ;;  %v827_v56 = vrot.slane %v737_v49, 4 }
  0x7b   :  { %v874_v63 = vsel %vm872_vm6, %v827_v56, %v737_v49 }
  0x7d   :  { %392 = vrot.lane.b32.xlu1 %v3381_v16, %s3220_s28  ;;  %390 = vrot.lane.b32.xlu0 %v3390_v17, %s3220_s28 }
  0x7f   :  { %v365_v53 = vpop.permute.xlu1 %364  ;;  %v363_v54 = vpop.permute.xlu0 %362 }
  0x80   :  { %502 = vst.msk [vmem:[#allocation2 + $0x8] sm:$0xf] %vm500_vm3, %v365_v53  ;;  %501 = vst.msk [vmem:[#allocation2] sm:$0xf] %vm500_vm3, %v363_v54 }
  0x81   :  { %578 = vrot.lane.b32.xlu1 %v3415_v22, %s3221_s18  ;;  %576 = vrot.lane.b32.xlu0 %v3381_v16, %s3221_s18 }
  0x83   :  { %v551_v60 = vpop.permute.xlu1 %550  ;;  %v549_v61 = vpop.permute.xlu0 %548 }
  0x84   :  { %688 = vst.msk [vmem:[#allocation2 + $0x8] sm:$0xf] %vm686_vm7, %v551_v60  ;;  %687 = vst.msk [vmem:[#allocation2] sm:$0xf] %vm686_vm7, %v549_v61 }
  0x85   :  { %969 = vst.msk [vmem:[#allocation2 + $0x8] sm:$0xff] %vm3714_vm8, %v874_v63  ;;  %968 = vst.msk [vmem:[#allocation2] sm:$0xff] %vm3714_vm8, %v873_v62  ;;  %210 = vrot.lane.b32.xlu1 %v3415_v22, %s3219_s16  ;;  %208 = vrot.lane.b32.xlu0 %v3381_v16, %s3219_s16 }
  0x87   :  { %v183_v0 = vpop.permute.xlu1 %182  ;;  %v181_v1 = vpop.permute.xlu0 %180 }
  0x88   :  { %318 = vst.msk [vmem:[#allocation2 + $0x18] sm:$0xf] %vm314_vm2, %v183_v0  ;;  %317 = vst.msk [vmem:[#allocation2 + $0x10] sm:$0xf] %vm314_vm2, %v181_v1 }
  0x89   :  { %768 = vrot.lane.b32.xlu1 %v3433_v24, %s3218_s15  ;;  %766 = vrot.lane.b32.xlu0 %v3438_v25, %s3218_s15 }
  0x8b   :  { %v741_v4 = vpop.permute.xlu1 %740  ;;  %v739_v5 = vpop.permute.xlu0 %738 }
  0x8c   :  { %v3099_v6 = vld [vmem:[#allocation2] ss:$8 sps:$4 sm:$0xff]   ;;  %v3101_v7 = vld [vmem:[#allocation2 + $0x4] ss:$8 sps:$4 sm:$0xff]   ;;  %v829_v10 = vrot.slane %v741_v4, 4  ;;  %v828_v11 = vrot.slane %v739_v5, 4 }
  0x8d   :  { %396 = vrot.lane.b32.xlu1 %v3410_v21, %s3220_s28  ;;  %394 = vrot.lane.b32.xlu0 %v3415_v22, %s3220_s28  ;;  %v3781_v22 = vld [vmem:[%s4621_s0 + $0x90] sm:$0xf] }
  0x8e   :  { %2748 = vmatprep.mubr.msk.bf16.mxu0 %vm1345_vm9, %v3101_v7  ;;  %v876_v14 = vsel %vm872_vm6, %v829_v10, %v741_v4  ;;  %v875_v15 = vsel %vm872_vm6, %v828_v11, %v739_v5  ;;  %120 = vst.msk [vmem:[#allocation2 + $0x120] sm:$0xf] %vm83_vm0, %v3781_v22 }
  0x8f   :  { %v369_v8 = vpop.permute.xlu1 %368  ;;  %v367_v9 = vpop.permute.xlu0 %366  ;;  %1452 = vmatmul.mubr.bf16.vlgmr.msra.gmra.mxu0 %v3099_v6 }
  0x90   :  { %504 = vst.msk [vmem:[#allocation2 + $0x18] sm:$0xf] %vm500_vm3, %v369_v8  ;;  %503 = vst.msk [vmem:[#allocation2 + $0x10] sm:$0xf] %vm500_vm3, %v367_v9 }
  0x91   :  { %582 = vrot.lane.b32.xlu1 %v3438_v25, %s3221_s18  ;;  %580 = vrot.lane.b32.xlu0 %v3410_v21, %s3221_s18 }
  0x93   :  { %v555_v12 = vpop.permute.xlu1 %554  ;;  %v553_v13 = vpop.permute.xlu0 %552 }
  0x94   :  { %690 = vst.msk [vmem:[#allocation2 + $0x18] sm:$0xf] %vm686_vm7, %v555_v12  ;;  %689 = vst.msk [vmem:[#allocation2 + $0x10] sm:$0xf] %vm686_vm7, %v553_v13  ;;  %v3863_v12 = vld [vmem:[%s4621_s0 + $0xb4] sm:$0xf] }
  0x95   :  { %971 = vst.msk [vmem:[#allocation2 + $0x18] sm:$0xff] %vm3714_vm8, %v876_v14  ;;  %970 = vst.msk [vmem:[#allocation2 + $0x10] sm:$0xff] %vm3714_vm8, %v875_v15  ;;  %214 = vrot.lane.b32.xlu1 %v3438_v25, %s3219_s16  ;;  %212 = vrot.lane.b32.xlu0 %v3410_v21, %s3219_s16 }
  0x96   :  { %129 = vst.msk [vmem:[#allocation2 + $0x168] sm:$0xf] %vm83_vm0, %v3863_v12 }
  0x97   :  { %v187_v16 = vpop.permute.xlu1 %186  ;;  %v185_v17 = vpop.permute.xlu0 %184 }
  0x98   :  { %320 = vst.msk [vmem:[#allocation2 + $0x28] sm:$0xf] %vm314_vm2, %v187_v16  ;;  %319 = vst.msk [vmem:[#allocation2 + $0x20] sm:$0xf] %vm314_vm2, %v185_v17 }
  0x99   :  { %772 = vrot.lane.b32.xlu1 %v3455_v27, %s3218_s15  ;;  %770 = vrot.lane.b32.xlu0 %v3466_v28, %s3218_s15 }
  0x9b   :  { %v745_v18 = vpop.permute.xlu1 %744  ;;  %v743_v19 = vpop.permute.xlu0 %742 }
  0x9c   :  { %v3102_v20 = vld [vmem:[#allocation2 + $0x14] ss:$8 sps:$4 sm:$0xff]   ;;  %v3104_v21 = vld [vmem:[#allocation2 + $0x10] ss:$8 sps:$4 sm:$0xff]   ;;  %v831_v29 = vrot.slane %v745_v18, 4  ;;  %v830_v30 = vrot.slane %v743_v19, 4 }
  0x9d   :  { %400 = vrot.lane.b32.xlu1 %v3433_v24, %s3220_s28  ;;  %398 = vrot.lane.b32.xlu0 %v3438_v25, %s3220_s28  ;;  %v3791_v25 = vld [vmem:[%s4621_s0 + $0xac] sm:$0xf] }
  0x9e   :  { %2749 = vmatprep.mubr.msk.bf16.mxu0 %vm1345_vm9, %v3102_v20  ;;  %127 = vst.msk [vmem:[#allocation2 + $0x158] sm:$0xf] %vm83_vm0, %v3791_v25  ;;  %v878_v36 = vsel %vm872_vm6, %v831_v29, %v745_v18  ;;  %v877_v45 = vsel %vm872_vm6, %v830_v30, %v743_v19 }
  0x9f   :  { %v373_v23 = vpop.permute.xlu1 %372  ;;  %v371_v26 = vpop.permute.xlu0 %370  ;;  %1460 = vmatmul.mubr.bf16.gmra.mxu0 %v3104_v21 }
  0xa0   :  { %506 = vst.msk [vmem:[#allocation2 + $0x28] sm:$0xf] %vm500_vm3, %v373_v23  ;;  %505 = vst.msk [vmem:[#allocation2 + $0x20] sm:$0xf] %vm500_vm3, %v371_v26 }
  0xa1   :  { %586 = vrot.lane.b32.xlu1 %v3466_v28, %s3221_s18  ;;  %584 = vrot.lane.b32.xlu0 %v3433_v24, %s3221_s18 }
  0xa3   :  { %v559_v32 = vpop.permute.xlu1 %558  ;;  %v557_v33 = vpop.permute.xlu0 %556 }
  0xa4   :  { %692 = vst.msk [vmem:[#allocation2 + $0x28] sm:$0xf] %vm686_vm7, %v559_v32  ;;  %691 = vst.msk [vmem:[#allocation2 + $0x20] sm:$0xf] %vm686_vm7, %v557_v33 }
  0xa5   :  { %973 = vst.msk [vmem:[#allocation2 + $0x28] sm:$0xff] %vm3714_vm8, %v878_v36  ;;  %972 = vst.msk [vmem:[#allocation2 + $0x20] sm:$0xff] %vm3714_vm8, %v877_v45  ;;  %218 = vrot.lane.b32.xlu1 %v3466_v28, %s3219_s16  ;;  %216 = vrot.lane.b32.xlu0 %v3433_v24, %s3219_s16 }
  0xa7   :  { %v191_v46 = vpop.permute.xlu1 %190  ;;  %v189_v49 = vpop.permute.xlu0 %188 }
  0xa8   :  { %322 = vst.msk [vmem:[#allocation2 + $0x38] sm:$0xf] %vm314_vm2, %v191_v46  ;;  %321 = vst.msk [vmem:[#allocation2 + $0x30] sm:$0xf] %vm314_vm2, %v189_v49 }
  0xa9   :  { %776 = vrot.lane.b32.xlu1 %v3508_v34, %s3218_s15  ;;  %774 = vrot.lane.b32.xlu0 %v3519_v35, %s3218_s15 }
  0xab   :  { %v749_v50 = vpop.permute.xlu1 %748  ;;  %v747_v53 = vpop.permute.xlu0 %746 }
  0xac   :  { %v3105_v54 = vld [vmem:[#allocation2 + $0x24] ss:$8 sps:$4 sm:$0xff]   ;;  %v3107_v24 = vld [vmem:[#allocation2 + $0x20] ss:$8 sps:$4 sm:$0xff]   ;;  %v833_v60 = vrot.slane %v749_v50, 4  ;;  %v832_v61 = vrot.slane %v747_v53, 4 }
  0xad   :  { %404 = vrot.lane.b32.xlu1 %v3455_v27, %s3220_s28  ;;  %402 = vrot.lane.b32.xlu0 %v3466_v28, %s3220_s28 }
  0xae   :  { %2750 = vmatprep.mubr.msk.bf16.mxu0 %vm1345_vm9, %v3105_v54  ;;  %v880_v63 = vsel %vm872_vm6, %v833_v60, %v749_v50  ;;  %v879_v0 = vsel %vm872_vm6, %v832_v61, %v747_v53 }
  0xaf   :  { %v377_v55 = vpop.permute.xlu1 %376  ;;  %v375_v56 = vpop.permute.xlu0 %374  ;;  %1468 = vmatmul.mubr.bf16.gmra.mxu0 %v3107_v24 }
  0xb0   :  { %508 = vst.msk [vmem:[#allocation2 + $0x38] sm:$0xf] %vm500_vm3, %v377_v55  ;;  %507 = vst.msk [vmem:[#allocation2 + $0x30] sm:$0xf] %vm500_vm3, %v375_v56 }
  0xb1   :  { %590 = vrot.lane.b32.xlu1 %v3519_v35, %s3221_s18  ;;  %588 = vrot.lane.b32.xlu0 %v3455_v27, %s3221_s18 }
  0xb3   :  { %v563_v62 = vpop.permute.xlu1 %562  ;;  %v561_v28 = vpop.permute.xlu0 %560 }
  0xb4   :  { %694 = vst.msk [vmem:[#allocation2 + $0x38] sm:$0xf] %vm686_vm7, %v563_v62  ;;  %693 = vst.msk [vmem:[#allocation2 + $0x30] sm:$0xf] %vm686_vm7, %v561_v28 }
  0xb5   :  { %975 = vst.msk [vmem:[#allocation2 + $0x38] sm:$0xff] %vm3714_vm8, %v880_v63  ;;  %974 = vst.msk [vmem:[#allocation2 + $0x30] sm:$0xff] %vm3714_vm8, %v879_v0  ;;  %222 = vrot.lane.b32.xlu1 %v3519_v35, %s3219_s16  ;;  %220 = vrot.lane.b32.xlu0 %v3455_v27, %s3219_s16 }
  0xb7   :  { %v195_v1 = vpop.permute.xlu1 %194  ;;  %v193_v4 = vpop.permute.xlu0 %192 }
  0xb8   :  { %324 = vst.msk [vmem:[#allocation2 + $0x48] sm:$0xf] %vm314_vm2, %v195_v1  ;;  %323 = vst.msk [vmem:[#allocation2 + $0x40] sm:$0xf] %vm314_vm2, %v193_v4 }
  0xb9   :  { %780 = vrot.lane.b32.xlu1 %v3540_v37, %s3218_s15  ;;  %778 = vrot.lane.b32.xlu0 %v3551_v38, %s3218_s15 }
  0xbb   :  { %v753_v5 = vpop.permute.xlu1 %752  ;;  %v751_v6 = vpop.permute.xlu0 %750 }
  0xbc   :  { %v3108_v7 = vld [vmem:[#allocation2 + $0x34] ss:$8 sps:$4 sm:$0xff]   ;;  %v3110_v27 = vld [vmem:[#allocation2 + $0x30] ss:$8 sps:$4 sm:$0xff]   ;;  %v835_v10 = vrot.slane %v753_v5, 4  ;;  %v834_v11 = vrot.slane %v751_v6, 4 }
  0xbd   :  { %408 = vrot.lane.b32.xlu1 %v3508_v34, %s3220_s28  ;;  %406 = vrot.lane.b32.xlu0 %v3519_v35, %s3220_s28  ;;  %v3874_v35 = vld [vmem:[%s4621_s0 + $0xb0] sm:$0xf] }
  0xbe   :  { %2751 = vmatprep.mubr.msk.bf16.mxu0 %vm1345_vm9, %v3108_v7  ;;  %128 = vst.msk [vmem:[#allocation2 + $0x160] sm:$0xf] %vm83_vm0, %v3874_v35  ;;  %v882_v15 = vsel %vm872_vm6, %v835_v10, %v753_v5  ;;  %v881_v16 = vsel %vm872_vm6, %v834_v11, %v751_v6  ;;  %vm2011_vm0 = vcmask 195588  }
  0xbf   :  { %v381_v8 = vpop.permute.xlu1 %380  ;;  %v379_v9 = vpop.permute.xlu0 %378  ;;  %1476 = vmatmul.mubr.bf16.gmra.mxu0 %v3110_v27 }
  0xc0   :  { %510 = vst.msk [vmem:[#allocation2 + $0x48] sm:$0xf] %vm500_vm3, %v381_v8  ;;  %509 = vst.msk [vmem:[#allocation2 + $0x40] sm:$0xf] %vm500_vm3, %v379_v9 }
  0xc1   :  { %594 = vrot.lane.b32.xlu1 %v3551_v38, %s3221_s18  ;;  %592 = vrot.lane.b32.xlu0 %v3508_v34, %s3221_s18 }
  0xc3   :  { %v567_v13 = vpop.permute.xlu1 %566  ;;  %v565_v14 = vpop.permute.xlu0 %564 }
  0xc4   :  { %696 = vst.msk [vmem:[#allocation2 + $0x48] sm:$0xf] %vm686_vm7, %v567_v13  ;;  %695 = vst.msk [vmem:[#allocation2 + $0x40] sm:$0xf] %vm686_vm7, %v565_v14 }
  0xc5   :  { %977 = vst.msk [vmem:[#allocation2 + $0x48] sm:$0xff] %vm3714_vm8, %v882_v15  ;;  %976 = vst.msk [vmem:[#allocation2 + $0x40] sm:$0xff] %vm3714_vm8, %v881_v16  ;;  %226 = vrot.lane.b32.xlu1 %v3551_v38, %s3219_s16  ;;  %224 = vrot.lane.b32.xlu0 %v3508_v34, %s3219_s16 }
  0xc7   :  { %v199_v17 = vpop.permute.xlu1 %198  ;;  %v197_v18 = vpop.permute.xlu0 %196 }
  0xc8   :  { %326 = vst.msk [vmem:[#allocation2 + $0x58] sm:$0xf] %vm314_vm2, %v199_v17  ;;  %325 = vst.msk [vmem:[#allocation2 + $0x50] sm:$0xf] %vm314_vm2, %v197_v18 }
  0xc9   :  { %784 = vrot.lane.b32.xlu1 %v3570_v39, %s3218_s15  ;;  %782 = vrot.lane.b32.xlu0 %v3581_v40, %s3218_s15 }
  0xcb   :  { %v757_v19 = vpop.permute.xlu1 %756  ;;  %v755_v20 = vpop.permute.xlu0 %754 }
  0xcc   :  { %v3111_v21 = vld [vmem:[#allocation2 + $0x44] ss:$8 sps:$4 sm:$0xff]   ;;  %v3113_v34 = vld [vmem:[#allocation2 + $0x40] ss:$8 sps:$4 sm:$0xff]   ;;  %v837_v29 = vrot.slane %v757_v19, 4  ;;  %v836_v30 = vrot.slane %v755_v20, 4 }
  0xcd   :  { %412 = vrot.lane.b32.xlu1 %v3540_v37, %s3220_s28  ;;  %410 = vrot.lane.b32.xlu0 %v3551_v38, %s3220_s28 }
  0xce   :  { %2752 = vmatprep.mubr.msk.bf16.mxu0 %vm1345_vm9, %v3111_v21  ;;  %v884_v33 = vsel %vm872_vm6, %v837_v29, %v757_v19  ;;  %v883_v36 = vsel %vm872_vm6, %v836_v30, %v755_v20 }
  0xcf   :  { %v385_v23 = vpop.permute.xlu1 %384  ;;  %v383_v26 = vpop.permute.xlu0 %382  ;;  %1484 = vmatmul.mubr.bf16.gmra.mxu0 %v3113_v34 }
  0xd0   :  { %512 = vst.msk [vmem:[#allocation2 + $0x58] sm:$0xf] %vm500_vm3, %v385_v23  ;;  %511 = vst.msk [vmem:[#allocation2 + $0x50] sm:$0xf] %vm500_vm3, %v383_v26 }
  0xd1   :  { %598 = vrot.lane.b32.xlu1 %v3581_v40, %s3221_s18  ;;  %596 = vrot.lane.b32.xlu0 %v3540_v37, %s3221_s18 }
  0xd3   :  { %v571_v32 = vpop.permute.xlu1 %570  ;;  %v569_v38 = vpop.permute.xlu0 %568 }
  0xd4   :  { %698 = vst.msk [vmem:[#allocation2 + $0x58] sm:$0xf] %vm686_vm7, %v571_v32  ;;  %697 = vst.msk [vmem:[#allocation2 + $0x50] sm:$0xf] %vm686_vm7, %v569_v38 }
  0xd5   :  { %979 = vst.msk [vmem:[#allocation2 + $0x58] sm:$0xff] %vm3714_vm8, %v884_v33  ;;  %978 = vst.msk [vmem:[#allocation2 + $0x50] sm:$0xff] %vm3714_vm8, %v883_v36  ;;  %230 = vrot.lane.b32.xlu1 %v3581_v40, %s3219_s16  ;;  %228 = vrot.lane.b32.xlu0 %v3540_v37, %s3219_s16 }
  0xd7   :  { %v203_v45 = vpop.permute.xlu1 %202  ;;  %v201_v46 = vpop.permute.xlu0 %200 }
  0xd8   :  { %328 = vst.msk [vmem:[#allocation2 + $0x68] sm:$0xf] %vm314_vm2, %v203_v45  ;;  %327 = vst.msk [vmem:[#allocation2 + $0x60] sm:$0xf] %vm314_vm2, %v201_v46 }
  0xd9   :  { %788 = vrot.lane.b32.xlu1 %v3600_v41, %s3218_s15  ;;  %786 = vrot.lane.b32.xlu0 %v3611_v42, %s3218_s15 }
  0xdb   :  { %v761_v49 = vpop.permute.xlu1 %760  ;;  %v759_v50 = vpop.permute.xlu0 %758 }
  0xdc   :  { %v3114_v53 = vld [vmem:[#allocation2 + $0x54] ss:$8 sps:$4 sm:$0xff]   ;;  %v3116_v37 = vld [vmem:[#allocation2 + $0x50] ss:$8 sps:$4 sm:$0xff]   ;;  %v839_v55 = vrot.slane %v761_v49, 4  ;;  %v838_v56 = vrot.slane %v759_v50, 4 }
  0xdd   :  { %416 = vrot.lane.b32.xlu1 %v3570_v39, %s3220_s28  ;;  %414 = vrot.lane.b32.xlu0 %v3581_v40, %s3220_s28 }
  0xde   :  { %2753 = vmatprep.mubr.msk.bf16.mxu0 %vm1345_vm9, %v3114_v53  ;;  %v886_v61 = vsel %vm872_vm6, %v839_v55, %v761_v49  ;;  %v885_v62 = vsel %vm872_vm6, %v838_v56, %v759_v50 }
  0xdf   :  { %v389_v54 = vpop.permute.xlu1 %388  ;;  %v387_v24 = vpop.permute.xlu0 %386  ;;  %1492 = vmatmul.mubr.bf16.gmra.mxu0 %v3116_v37 }
  0xe0   :  { %514 = vst.msk [vmem:[#allocation2 + $0x68] sm:$0xf] %vm500_vm3, %v389_v54  ;;  %513 = vst.msk [vmem:[#allocation2 + $0x60] sm:$0xf] %vm500_vm3, %v387_v24 }
  0xe1   :  { %602 = vrot.lane.b32.xlu1 %v3611_v42, %s3221_s18  ;;  %600 = vrot.lane.b32.xlu0 %v3570_v39, %s3221_s18 }
  0xe3   :  { %v575_v60 = vpop.permute.xlu1 %574  ;;  %v573_v40 = vpop.permute.xlu0 %572 }
  0xe4   :  { %700 = vst.msk [vmem:[#allocation2 + $0x68] sm:$0xf] %vm686_vm7, %v575_v60  ;;  %699 = vst.msk [vmem:[#allocation2 + $0x60] sm:$0xf] %vm686_vm7, %v573_v40 }
  0xe5   :  { %981 = vst.msk [vmem:[#allocation2 + $0x68] sm:$0xff] %vm3714_vm8, %v886_v61  ;;  %980 = vst.msk [vmem:[#allocation2 + $0x60] sm:$0xff] %vm3714_vm8, %v885_v62  ;;  %234 = vrot.lane.b32.xlu1 %v3611_v42, %s3219_s16  ;;  %232 = vrot.lane.b32.xlu0 %v3570_v39, %s3219_s16 }
  0xe7   :  { %v207_v28 = vpop.permute.xlu1 %206  ;;  %v205_v63 = vpop.permute.xlu0 %204 }
  0xe8   :  { %330 = vst.msk [vmem:[#allocation2 + $0x78] sm:$0xf] %vm314_vm2, %v207_v28  ;;  %329 = vst.msk [vmem:[#allocation2 + $0x70] sm:$0xf] %vm314_vm2, %v205_v63 }
  0xe9   :  { %792 = vrot.lane.b32.xlu1 %v3630_v43, %s3218_s15  ;;  %790 = vrot.lane.b32.xlu0 %v3641_v44, %s3218_s15 }
  0xeb   :  { %v765_v0 = vpop.permute.xlu1 %764  ;;  %v763_v1 = vpop.permute.xlu0 %762 }
  0xec   :  { %v3117_v4 = vld [vmem:[#allocation2 + $0x64] ss:$8 sps:$4 sm:$0xff]   ;;  %v3119_v39 = vld [vmem:[#allocation2 + $0x60] ss:$8 sps:$4 sm:$0xff]   ;;  %v841_v7 = vrot.slane %v765_v0, 4  ;;  %v840_v27 = vrot.slane %v763_v1, 4 }
  0xed   :  { %420 = vrot.lane.b32.xlu1 %v3600_v41, %s3220_s28  ;;  %418 = vrot.lane.b32.xlu0 %v3611_v42, %s3220_s28 }
  0xee   :  { %2754 = vmatprep.mubr.msk.bf16.mxu0 %vm1345_vm9, %v3117_v4  ;;  %v888_v9 = vsel %vm872_vm6, %v841_v7, %v765_v0  ;;  %v887_v10 = vsel %vm872_vm6, %v840_v27, %v763_v1 }
  0xef   :  { %v393_v5 = vpop.permute.xlu1 %392  ;;  %v391_v6 = vpop.permute.xlu0 %390  ;;  %1500 = vmatmul.mubr.bf16.gmra.mxu0 %v3119_v39 }
  0xf0   :  { %516 = vst.msk [vmem:[#allocation2 + $0x78] sm:$0xf] %vm500_vm3, %v393_v5  ;;  %515 = vst.msk [vmem:[#allocation2 + $0x70] sm:$0xf] %vm500_vm3, %v391_v6 }
  0xf1   :  { %606 = vrot.lane.b32.xlu1 %v3641_v44, %s3221_s18  ;;  %604 = vrot.lane.b32.xlu0 %v3600_v41, %s3221_s18 }
  0xf3   :  { %v579_v8 = vpop.permute.xlu1 %578  ;;  %v577_v42 = vpop.permute.xlu0 %576 }
  0xf4   :  { %702 = vst.msk [vmem:[#allocation2 + $0x78] sm:$0xf] %vm686_vm7, %v579_v8  ;;  %701 = vst.msk [vmem:[#allocation2 + $0x70] sm:$0xf] %vm686_vm7, %v577_v42 }
  0xf5   :  { %983 = vst.msk [vmem:[#allocation2 + $0x78] sm:$0xff] %vm3714_vm8, %v888_v9  ;;  %982 = vst.msk [vmem:[#allocation2 + $0x70] sm:$0xff] %vm3714_vm8, %v887_v10  ;;  %238 = vrot.lane.b32.xlu1 %v3641_v44, %s3219_s16  ;;  %236 = vrot.lane.b32.xlu0 %v3600_v41, %s3219_s16 }
  0xf7   :  { %v211_v11 = vpop.permute.xlu1 %210  ;;  %v209_v13 = vpop.permute.xlu0 %208 }
  0xf8   :  { %332 = vst.msk [vmem:[#allocation2 + $0x88] sm:$0xf] %vm314_vm2, %v211_v11  ;;  %331 = vst.msk [vmem:[#allocation2 + $0x80] sm:$0xf] %vm314_vm2, %v209_v13 }
  0xf9   :  { %250 = vrot.lane.b32.xlu1 %v3661_v47, %s3219_s16  ;;  %248 = vrot.lane.b32.xlu0 %v3672_v48, %s3219_s16 }
  0xfb   :  { %v769_v14 = vpop.permute.xlu1 %768  ;;  %v767_v15 = vpop.permute.xlu0 %766 }
  0xfc   :  { %v3120_v16 = vld [vmem:[#allocation2 + $0x74] ss:$8 sps:$4 sm:$0xff]   ;;  %v3122_v41 = vld [vmem:[#allocation2 + $0x70] ss:$8 sps:$4 sm:$0xff]   ;;  %v843_v19 = vrot.slane %v769_v14, 4  ;;  %v842_v20 = vrot.slane %v767_v15, 4 }
  0xfd   :  { %796 = vrot.lane.b32.xlu1 %v3684_v51, %s3218_s15  ;;  %794 = vrot.lane.b32.xlu0 %v3689_v52, %s3218_s15 }
  0xfe   :  { %2755 = vmatprep.mubr.msk.bf16.mxu0 %vm1345_vm9, %v3120_v16  ;;  %v890_v23 = vsel %vm872_vm6, %v843_v19, %v769_v14  ;;  %v889_v26 = vsel %vm872_vm6, %v842_v20, %v767_v15 }
  0xff   :  { %v397_v17 = vpop.permute.xlu1 %396  ;;  %v395_v18 = vpop.permute.xlu0 %394  ;;  %1508 = vmatmul.mubr.bf16.gmra.mxu0 %v3122_v41 }
 0x100   :  { %518 = vst.msk [vmem:[#allocation2 + $0x88] sm:$0xf] %vm500_vm3, %v397_v17  ;;  %517 = vst.msk [vmem:[#allocation2 + $0x80] sm:$0xf] %vm500_vm3, %v395_v18 }
 0x101   :  { %808 = vrot.lane.b32.xlu1 %v3700_v57, %s3218_s15  ;;  %806 = vrot.lane.b32.xlu0 %v3711_v58, %s3218_s15 }
 0x103   :  { %v583_v21 = vpop.permute.xlu1 %582  ;;  %v581_v34 = vpop.permute.xlu0 %580 }
 0x104   :  { %704 = vst.msk [vmem:[#allocation2 + $0x88] sm:$0xf] %vm686_vm7, %v583_v21  ;;  %703 = vst.msk [vmem:[#allocation2 + $0x80] sm:$0xf] %vm686_vm7, %v581_v34 }
 0x105   :  { %985 = vst.msk [vmem:[#allocation2 + $0x88] sm:$0xff] %vm3714_vm8, %v890_v23  ;;  %984 = vst.msk [vmem:[#allocation2 + $0x80] sm:$0xff] %vm3714_vm8, %v889_v26  ;;  %424 = vrot.lane.b32.xlu1 %v3630_v43, %s3220_s28  ;;  %422 = vrot.lane.b32.xlu0 %v3641_v44, %s3220_s28 }
 0x107   :  { %v215_v29 = vpop.permute.xlu1 %214  ;;  %v213_v30 = vpop.permute.xlu0 %212 }
 0x108   :  { %334 = vst.msk [vmem:[#allocation2 + $0x98] sm:$0xf] %vm314_vm2, %v215_v29  ;;  %333 = vst.msk [vmem:[#allocation2 + $0x90] sm:$0xf] %vm314_vm2, %v213_v30 }
 0x109   :  { %436 = vrot.lane.b32.xlu1 %v3737_v2, %s3220_s28  ;;  %434 = vrot.lane.b32.xlu0 %v3661_v47, %s3220_s28 }
 0x10b   :  { %v773_v32 = vpop.permute.xlu1 %772  ;;  %v771_v38 = vpop.permute.xlu0 %770 }
 0x10c   :  { %v3123_v33 = vld [vmem:[#allocation2 + $0x84] ss:$8 sps:$4 sm:$0xff]   ;;  %v3125_v44 = vld [vmem:[#allocation2 + $0x80] ss:$8 sps:$4 sm:$0xff]   ;;  %v845_v46 = vrot.slane %v773_v32, 4  ;;  %v844_v49 = vrot.slane %v771_v38, 4 }
 0x10d   :  { %610 = vrot.lane.b32.xlu1 %v3689_v52, %s3221_s18  ;;  %608 = vrot.lane.b32.xlu0 %v3630_v43, %s3221_s18 }
 0x10e   :  { %2756 = vmatprep.mubr.msk.bf16.mxu0 %vm1345_vm9, %v3123_v33  ;;  %v892_v37 = vsel %vm872_vm6, %v845_v46, %v773_v32  ;;  %v891_v54 = vsel %vm872_vm6, %v844_v49, %v771_v38 }
 0x10f   :  { %v401_v36 = vpop.permute.xlu1 %400  ;;  %v399_v45 = vpop.permute.xlu0 %398  ;;  %1516 = vmatmul.mubr.bf16.gmra.mxu0 %v3125_v44 }
 0x110   :  { %520 = vst.msk [vmem:[#allocation2 + $0x98] sm:$0xf] %vm500_vm3, %v401_v36  ;;  %519 = vst.msk [vmem:[#allocation2 + $0x90] sm:$0xf] %vm500_vm3, %v399_v45 }
 0x111   :  { %622 = vrot.lane.b32.xlu1 %v3711_v58, %s3221_s18  ;;  %620 = vrot.lane.b32.xlu0 %v3737_v2, %s3221_s18 }
 0x113   :  { %v587_v50 = vpop.permute.xlu1 %586  ;;  %v585_v53 = vpop.permute.xlu0 %584 }
 0x114   :  { %706 = vst.msk [vmem:[#allocation2 + $0x98] sm:$0xf] %vm686_vm7, %v587_v50  ;;  %705 = vst.msk [vmem:[#allocation2 + $0x90] sm:$0xf] %vm686_vm7, %v585_v53 }
 0x115   :  { %987 = vst.msk [vmem:[#allocation2 + $0x98] sm:$0xff] %vm3714_vm8, %v892_v37  ;;  %986 = vst.msk [vmem:[#allocation2 + $0x90] sm:$0xff] %vm3714_vm8, %v891_v54  ;;  %242 = vrot.lane.b32.xlu1 %v3689_v52, %s3219_s16  ;;  %240 = vrot.lane.b32.xlu0 %v3630_v43, %s3219_s16 }
 0x117   :  { %v219_v24 = vpop.permute.xlu1 %218  ;;  %v217_v55 = vpop.permute.xlu0 %216 }
 0x118   :  { %336 = vst.msk [vmem:[#allocation2 + $0xa8] sm:$0xf] %vm314_vm2, %v219_v24  ;;  %335 = vst.msk [vmem:[#allocation2 + $0xa0] sm:$0xf] %vm314_vm2, %v217_v55  ;;  %v4154_v55 = vld [vmem:[%s4621_s0 + $0xbc] sm:$0xf] }
 0x119   :  { %254 = vrot.lane.b32.xlu1 %v3711_v58, %s3219_s16  ;;  %252 = vrot.lane.b32.xlu0 %v3737_v2, %s3219_s16 }
 0x11b   :  { %v777_v56 = vpop.permute.xlu1 %776  ;;  %v775_v60 = vpop.permute.xlu0 %774 }
 0x11c   :  { %v3126_v40 = vld [vmem:[#allocation2 + $0x94] ss:$8 sps:$4 sm:$0xff]   ;;  %v3128_v43 = vld [vmem:[#allocation2 + $0x90] ss:$8 sps:$4 sm:$0xff]   ;;  %v847_v28 = vrot.slane %v777_v56, 4  ;;  %v846_v63 = vrot.slane %v775_v60, 4 }
 0x11d   :  { %800 = vrot.lane.b32.xlu1 %v3672_v48, %s3218_s15  ;;  %798 = vrot.lane.b32.xlu0 %v3781_v22, %s3218_s15 }
 0x11e   :  { %2757 = vmatprep.mubr.msk.bf16.mxu0 %vm1345_vm9, %v3126_v40  ;;  %v894_v4 = vsel %vm872_vm6, %v847_v28, %v777_v56  ;;  %v893_v39 = vsel %vm872_vm6, %v846_v63, %v775_v60  ;;  %v4159_v56 = vld [vmem:[%s4621_s0 + $0xb8] sm:$0xf] }
 0x11f   :  { %v405_v61 = vpop.permute.xlu1 %404  ;;  %v403_v62 = vpop.permute.xlu0 %402  ;;  %1524 = vmatmul.mubr.bf16.gmra.mxu0 %v3128_v43 }
 0x120   :  { %522 = vst.msk [vmem:[#allocation2 + $0xa8] sm:$0xf] %vm500_vm3, %v405_v61  ;;  %521 = vst.msk [vmem:[#allocation2 + $0xa0] sm:$0xf] %vm500_vm3, %v403_v62 }
 0x121   :  { %812 = vrot.lane.b32.xlu1 %v3791_v25, %s3218_s15  ;;  %810 = vrot.lane.b32.xlu0 %v3802_v31, %s3218_s15 }
 0x123   :  { %v591_v0 = vpop.permute.xlu1 %590  ;;  %v589_v1 = vpop.permute.xlu0 %588 }
 0x124   :  { %708 = vst.msk [vmem:[#allocation2 + $0xa8] sm:$0xf] %vm686_vm7, %v591_v0  ;;  %707 = vst.msk [vmem:[#allocation2 + $0xa0] sm:$0xf] %vm686_vm7, %v589_v1  ;;  %v4175_v0 = vld [vmem:[%s4623_s2] ss:$0 sm:$0xff] }
 0x125   :  { %989 = vst.msk [vmem:[#allocation2 + $0xa8] sm:$0xff] %vm3714_vm8, %v894_v4  ;;  %988 = vst.msk [vmem:[#allocation2 + $0xa0] sm:$0xff] %vm3714_vm8, %v893_v39  ;;  %428 = vrot.lane.b32.xlu1 %v3684_v51, %s3220_s28  ;;  %426 = vrot.lane.b32.xlu0 %v3689_v52, %s3220_s28 }
 0x127   :  { %v223_v5 = vpop.permute.xlu1 %222  ;;  %v221_v6 = vpop.permute.xlu0 %220 }
 0x128   :  { %338 = vst.msk [vmem:[#allocation2 + $0xb8] sm:$0xf] %vm314_vm2, %v223_v5  ;;  %337 = vst.msk [vmem:[#allocation2 + $0xb0] sm:$0xf] %vm314_vm2, %v221_v6 }
 0x129   :  { %440 = vrot.lane.b32.xlu1 %v3700_v57, %s3220_s28  ;;  %438 = vrot.lane.b32.xlu0 %v3711_v58, %s3220_s28 }
 0x12b   :  { %v781_v7 = vpop.permute.xlu1 %780  ;;  %v779_v27 = vpop.permute.xlu0 %778 }
 0x12c   :  { %v3129_v8 = vld [vmem:[#allocation2 + $0xa4] ss:$8 sps:$4 sm:$0xff]   ;;  %v3131_v52 = vld [vmem:[#allocation2 + $0xa0] ss:$8 sps:$4 sm:$0xff]   ;;  %v849_v10 = vrot.slane %v781_v7, 4  ;;  %v848_v11 = vrot.slane %v779_v27, 4 }
 0x12d   :  { %614 = vrot.lane.b32.xlu1 %v3781_v22, %s3221_s18  ;;  %612 = vrot.lane.b32.xlu0 %v3684_v51, %s3221_s18 }
 0x12e   :  { %2758 = vmatprep.mubr.msk.bf16.mxu0 %vm1345_vm9, %v3129_v8  ;;  %v896_v14 = vsel %vm872_vm6, %v849_v10, %v781_v7  ;;  %v895_v15 = vsel %vm872_vm6, %v848_v11, %v779_v27 }
 0x12f   :  { %v409_v42 = vpop.permute.xlu1 %408  ;;  %v407_v9 = vpop.permute.xlu0 %406  ;;  %1532 = vmatmul.mubr.bf16.gmra.mxu0 %v3131_v52 }
 0x130   :  { %524 = vst.msk [vmem:[#allocation2 + $0xb8] sm:$0xf] %vm500_vm3, %v409_v42  ;;  %523 = vst.msk [vmem:[#allocation2 + $0xb0] sm:$0xf] %vm500_vm3, %v407_v9 }
 0x131   :  { %626 = vrot.lane.b32.xlu1 %v3802_v31, %s3221_s18  ;;  %624 = vrot.lane.b32.xlu0 %v3700_v57, %s3221_s18 }
 0x133   :  { %v595_v58 = vpop.permute.xlu1 %594  ;;  %v593_v13 = vpop.permute.xlu0 %592 }
 0x134   :  { %710 = vst.msk [vmem:[#allocation2 + $0xb8] sm:$0xf] %vm686_vm7, %v595_v58  ;;  %709 = vst.msk [vmem:[#allocation2 + $0xb0] sm:$0xf] %vm686_vm7, %v593_v13  ;;  %v81_v13 = vld [vmem:[%s4621_s0 + $0xc0] sm:$0xf] }
 0x135   :  { %991 = vst.msk [vmem:[#allocation2 + $0xb8] sm:$0xff] %vm3714_vm8, %v896_v14  ;;  %990 = vst.msk [vmem:[#allocation2 + $0xb0] sm:$0xff] %vm3714_vm8, %v895_v15  ;;  %246 = vrot.lane.b32.xlu1 %v3781_v22, %s3219_s16  ;;  %244 = vrot.lane.b32.xlu0 %v3684_v51, %s3219_s16  ;;  %v82_v14 = vld [vmem:[%s4621_s0 + $0xc4] sm:$0xf]  ;;  %s3222_s0 = smov 40  }
 0x137   :  { %v227_v16 = vpop.permute.xlu1 %226  ;;  %v225_v41 = vpop.permute.xlu0 %224 }
 0x138   :  { %340 = vst.msk [vmem:[#allocation2 + $0xc8] sm:$0xf] %vm314_vm2, %v227_v16  ;;  %339 = vst.msk [vmem:[#allocation2 + $0xc0] sm:$0xf] %vm314_vm2, %v225_v41 }
 0x139   :  { %258 = vrot.lane.b32.xlu1 %v3802_v31, %s3219_s16  ;;  %256 = vrot.lane.b32.xlu0 %v3700_v57, %s3219_s16 }
 0x13b   :  { %v785_v17 = vpop.permute.xlu1 %784  ;;  %v783_v18 = vpop.permute.xlu0 %782 }
 0x13c   :  { %v3132_v19 = vld [vmem:[#allocation2 + $0xb4] ss:$8 sps:$4 sm:$0xff]   ;;  %v3134_v51 = vld [vmem:[#allocation2 + $0xb0] ss:$8 sps:$4 sm:$0xff]   ;;  %v851_v34 = vrot.slane %v785_v17, 4  ;;  %v850_v23 = vrot.slane %v783_v18, 4 }
 0x13d   :  { %804 = vrot.lane.b32.xlu1 %v3737_v2, %s3218_s15  ;;  %802 = vrot.lane.b32.xlu0 %v3661_v47, %s3218_s15 }
 0x13e   :  { %2759 = vmatprep.mubr.msk.bf16.mxu0 %vm1345_vm9, %v3132_v19  ;;  %v898_v26 = vsel %vm872_vm6, %v851_v34, %v785_v17  ;;  %v897_v29 = vsel %vm872_vm6, %v850_v23, %v783_v18 }
 0x13f   :  { %v413_v20 = vpop.permute.xlu1 %412  ;;  %v411_v21 = vpop.permute.xlu0 %410  ;;  %1540 = vmatmul.mubr.bf16.gmra.mxu0 %v3134_v51 }
 0x140   :  { %526 = vst.msk [vmem:[#allocation2 + $0xc8] sm:$0xf] %vm500_vm3, %v413_v20  ;;  %525 = vst.msk [vmem:[#allocation2 + $0xc0] sm:$0xf] %vm500_vm3, %v411_v21 }
 0x141   :  { %816 = vrot.lane.b32.xlu1 %v3863_v12, %s3218_s15  ;;  %814 = vrot.lane.b32.xlu0 %v3874_v35, %s3218_s15 }
 0x143   :  { %v599_v57 = vpop.permute.xlu1 %598  ;;  %v597_v2 = vpop.permute.xlu0 %596 }
 0x144   :  { %712 = vst.msk [vmem:[#allocation2 + $0xc8] sm:$0xf] %vm686_vm7, %v599_v57  ;;  %711 = vst.msk [vmem:[#allocation2 + $0xc0] sm:$0xf] %vm686_vm7, %v597_v2 }
 0x145   :  { %993 = vst.msk [vmem:[#allocation2 + $0xc8] sm:$0xff] %vm3714_vm8, %v898_v26  ;;  %992 = vst.msk [vmem:[#allocation2 + $0xc0] sm:$0xff] %vm3714_vm8, %v897_v29  ;;  %432 = vrot.lane.b32.xlu1 %v3672_v48, %s3220_s28  ;;  %430 = vrot.lane.b32.xlu0 %v3781_v22, %s3220_s28 }
 0x147   :  { %v231_v30 = vpop.permute.xlu1 %230  ;;  %v229_v32 = vpop.permute.xlu0 %228 }
 0x148   :  { %342 = vst.msk [vmem:[#allocation2 + $0xd8] sm:$0xf] %vm314_vm2, %v231_v30  ;;  %341 = vst.msk [vmem:[#allocation2 + $0xd0] sm:$0xf] %vm314_vm2, %v229_v32 }
 0x149   :  { %444 = vrot.lane.b32.xlu1 %v3791_v25, %s3220_s28  ;;  %442 = vrot.lane.b32.xlu0 %v3802_v31, %s3220_s28 }
 0x14b   :  { %v789_v38 = vpop.permute.xlu1 %788  ;;  %v787_v33 = vpop.permute.xlu0 %786 }
 0x14c   :  { %v3135_v44 = vld [vmem:[#allocation2 + $0xc4] ss:$8 sps:$4 sm:$0xff]   ;;  %v3137_v22 = vld [vmem:[#allocation2 + $0xc0] ss:$8 sps:$4 sm:$0xff]   ;;  %v853_v46 = vrot.slane %v789_v38, 4  ;;  %v852_v49 = vrot.slane %v787_v33, 4 }
 0x14d   :  { %618 = vrot.lane.b32.xlu1 %v3661_v47, %s3221_s18  ;;  %616 = vrot.lane.b32.xlu0 %v3672_v48, %s3221_s18 }
 0x14e   :  { %2760 = vmatprep.mubr.msk.bf16.mxu0 %vm1345_vm9, %v3135_v44  ;;  %v900_v53 = vsel %vm872_vm6, %v853_v46, %v789_v38  ;;  %v899_v37 = vsel %vm872_vm6, %v852_v49, %v787_v33 }
 0x14f   :  { %v417_v36 = vpop.permute.xlu1 %416  ;;  %v415_v45 = vpop.permute.xlu0 %414  ;;  %1548 = vmatmul.mubr.bf16.gmra.mxu0 %v3137_v22 }
 0x150   :  { %528 = vst.msk [vmem:[#allocation2 + $0xd8] sm:$0xf] %vm500_vm3, %v417_v36  ;;  %527 = vst.msk [vmem:[#allocation2 + $0xd0] sm:$0xf] %vm500_vm3, %v415_v45  ;;  %v1453_v31 = vpop.f32.mrf.mxu0 }
 0x151   :  { %630 = vrot.lane.b32.xlu1 %v3874_v35, %s3221_s18  ;;  %628 = vrot.lane.b32.xlu0 %v3791_v25, %s3221_s18  ;;  %v1454_v6 = vadd.f32 %v4175_v0, %v1453_v31 }
 0x152   :  { %v1455_v47 = vpop.f32.mrf.mxu0 }
 0x153   :  { %v603_v48 = vpop.permute.xlu1 %602  ;;  %v601_v50 = vpop.permute.xlu0 %600  ;;  %v2891_v15 = vpack.c.bf16 %v1454_v6, %v1454_v6 }
 0x154   :  { %714 = vst.msk [vmem:[#allocation2 + $0xd8] sm:$0xf] %vm686_vm7, %v603_v48  ;;  %713 = vst.msk [vmem:[#allocation2 + $0xd0] sm:$0xf] %vm686_vm7, %v601_v50  ;;  %v1456_v54 = vpop.f32.mrf.mxu0 }
 0x155   :  { %995 = vst.msk [vmem:[#allocation2 + $0xd8] sm:$0xff] %vm3714_vm8, %v900_v53  ;;  %994 = vst.msk [vmem:[#allocation2 + $0xd0] sm:$0xff] %vm3714_vm8, %v899_v37  ;;  %262 = vrot.lane.b32.xlu1 %v3874_v35, %s3219_s16  ;;  %260 = vrot.lane.b32.xlu0 %v3791_v25, %s3219_s16 }
 0x156   :  { %v1458_v24 = vpop.f32.mrf.mxu0 }
 0x157   :  { %v235_v60 = vpop.permute.xlu1 %234  ;;  %v233_v40 = vpop.permute.xlu0 %232 }
 0x158   :  { %344 = vst.msk [vmem:[#allocation2 + $0xe8] sm:$0xf] %vm314_vm2, %v235_v60  ;;  %343 = vst.msk [vmem:[#allocation2 + $0xe0] sm:$0xf] %vm314_vm2, %v233_v40 }
 0x159   :  { %820 = vrot.lane.b32.xlu1 %v4154_v55, %s3218_s15  ;;  %818 = vrot.lane.b32.xlu0 %v4159_v56, %s3218_s15 }
 0x15b   :  { %v793_v25 = vpop.permute.xlu1 %792  ;;  %v791_v43 = vpop.permute.xlu0 %790 }
 0x15c   :  { %v3138_v61 = vld [vmem:[#allocation2 + $0xd4] ss:$8 sps:$4 sm:$0xff]   ;;  %v3140_v62 = vld [vmem:[#allocation2 + $0xd0] ss:$8 sps:$4 sm:$0xff]   ;;  %v855_v1 = vrot.slane %v793_v25, 4  ;;  %v854_v4 = vrot.slane %v791_v43, 4 }
 0x15d   :  { %448 = vrot.lane.b32.xlu1 %v3863_v12, %s3220_s28  ;;  %446 = vrot.lane.b32.xlu0 %v3874_v35, %s3220_s28  ;;  %v1457_v35 = vadd.f32 %v4175_v0, %v1456_v54 }
 0x15e   :  { %2761 = vmatprep.mubr.msk.bf16.mxu0 %vm1345_vm9, %v3138_v61  ;;  %v902_v52 = vsel %vm872_vm6, %v855_v1, %v793_v25  ;;  %v901_v42 = vsel %vm872_vm6, %v854_v4, %v791_v43 }
 0x15f   :  { %v421_v28 = vpop.permute.xlu1 %420  ;;  %v419_v63 = vpop.permute.xlu0 %418  ;;  %1556 = vmatmul.mubr.bf16.gmra.mxu0 %v3140_v62  ;;  %v2892_v10 = vpack.c.bf16 %v1457_v35, %v1457_v35 }
 0x160   :  { %530 = vst.msk [vmem:[#allocation2 + $0xe8] sm:$0xf] %vm500_vm3, %v421_v28  ;;  %529 = vst.msk [vmem:[#allocation2 + $0xe0] sm:$0xf] %vm500_vm3, %v419_v63  ;;  %v1461_v39 = vpop.f32.mrf.mxu0 }
 0x161   :  { %634 = vrot.lane.b32.xlu1 %v4159_v56, %s3221_s18  ;;  %632 = vrot.lane.b32.xlu0 %v3863_v12, %s3221_s18  ;;  %v1462_v7 = vadd.f32 %v4175_v0, %v1461_v39 }
 0x162   :  { %v1463_v5 = vpop.f32.mrf.mxu0 }
 0x163   :  { %v607_v27 = vpop.permute.xlu1 %606  ;;  %v605_v8 = vpop.permute.xlu0 %604  ;;  %v2893_v16 = vpack.c.bf16 %v1462_v7, %v1462_v7 }
 0x164   :  { %716 = vst.msk [vmem:[#allocation2 + $0xe8] sm:$0xf] %vm686_vm7, %v607_v27  ;;  %715 = vst.msk [vmem:[#allocation2 + $0xe0] sm:$0xf] %vm686_vm7, %v605_v8  ;;  %v1464_v9 = vpop.f32.mrf.mxu0 }
 0x165   :  { %997 = vst.msk [vmem:[#allocation2 + $0xe8] sm:$0xff] %vm3714_vm8, %v902_v52  ;;  %996 = vst.msk [vmem:[#allocation2 + $0xe0] sm:$0xff] %vm3714_vm8, %v901_v42  ;;  %v1465_v11 = vadd.f32 %v4175_v0, %v1464_v9  ;;  %264 = vrot.lane.b32.xlu0 %v3863_v12, %s3219_s16  ;;  %266 = vrot.lane.b32.xlu1 %v4159_v56, %s3219_s16  ;;  %v1810_v12 = vmax.bf16 %v2892_v10, %v2891_v15 }
 0x166   :  { %v1466_v58 = vpop.f32.mrf.mxu0 }
 0x167   :  { %v2894_v41 = vpack.c.bf16 %v1465_v11, %v1465_v11  ;;  %v239_v17 = vpop.permute.xlu1 %238  ;;  %v237_v18 = vpop.permute.xlu0 %236 }
 0x168   :  { %346 = vst.msk [vmem:[#allocation2 + $0xf8] sm:$0xf] %vm314_vm2, %v239_v17  ;;  %345 = vst.msk [vmem:[#allocation2 + $0xf0] sm:$0xf] %vm314_vm2, %v237_v18 }
 0x169   :  { %v1821_v19 = vmax.bf16 %v2894_v41, %v2893_v16  ;;  %822 = vrot.lane.b32.xlu0 %v81_v13, %s3218_s15  ;;  %824 = vrot.lane.b32.xlu1 %v82_v14, %s3218_s15 }
 0x16b   :  { %v1832_v51 = vmax.bf16 %v1821_v19, %v1810_v12  ;;  %v251_v20 = vpop.permute.xlu1 %250  ;;  %v249_v21 = vpop.permute.xlu0 %248 }
 0x16c   :  { %352 = vst.msk [vmem:[#allocation2 + $0x128] sm:$0xf] %vm314_vm2, %v251_v20  ;;  %351 = vst.msk [vmem:[#allocation2 + $0x120] sm:$0xf] %vm314_vm2, %v249_v21  ;;  %v3141_v34 = vld [vmem:[#allocation2 + $0xe4] ss:$8 sps:$4 sm:$0xff]  }
 0x16d   :  { %v3143_v23 = vld [vmem:[#allocation2 + $0xe0] ss:$8 sps:$4 sm:$0xff]   ;;  %450 = vrot.lane.b32.xlu0 %v4159_v56, %s3220_s28  ;;  %452 = vrot.lane.b32.xlu1 %v4154_v55, %s3220_s28  ;;  %v1843_v57 = vmax.bf16 %v3217_v3, %v1832_v51 }
 0x16e   :  { %2762 = vmatprep.mubr.msk.bf16.mxu0 %vm1345_vm9, %v3141_v34 }
 0x16f   :  { %v797_v2 = vpop.permute.xlu1 %796  ;;  %v795_v26 = vpop.permute.xlu0 %794  ;;  %1564 = vmatmul.mubr.bf16.gmra.mxu0 %v3143_v23  ;;  %1855 = vst.msk [vmem:[#allocation3] sm:$0xf] %vm1854_vm10, %v1843_v57 }
 0x170   :  { %v1469_v29 = vpop.f32.mrf.mxu0  ;;  %v857_v49 = vrot.slane %v797_v2, 4  ;;  %v856_v31 = vrot.slane %v795_v26, 4 }
 0x171   :  { %636 = vrot.lane.b32.xlu0 %v4154_v55, %s3221_s18  ;;  %638 = vrot.lane.b32.xlu1 %v81_v13, %s3221_s18  ;;  %v1470_v60 = vadd.f32 %v4175_v0, %v1469_v29 }
 0x172   :  { %v1471_v30 = vpop.f32.mrf.mxu0  ;;  %v904_v50 = vsel %vm872_vm6, %v857_v49, %v797_v2  ;;  %v903_v53 = vsel %vm872_vm6, %v856_v31, %v795_v26 }
 0x173   :  { %v809_v32 = vpop.permute.xlu1 %808  ;;  %v807_v38 = vpop.permute.xlu0 %806  ;;  %v2895_v39 = vpack.c.bf16 %v1470_v60, %v1470_v60 }
 0x174   :  { %v1472_v33 = vpop.f32.mrf.mxu0  ;;  %v863_v37 = vrot.slane %v809_v32, 4  ;;  %v862_v54 = vrot.slane %v807_v38, 4 }
 0x175   :  { %v1473_v55 = vadd.f32 %v4175_v0, %v1472_v33 }
 0x176   :  { %v1474_v44 = vpop.f32.mrf.mxu0  ;;  %v910_v61 = vsel %vm872_vm6, %v863_v37, %v809_v32  ;;  %v909_v62 = vsel %vm872_vm6, %v862_v54, %v807_v38 }
 0x177   :  { %v425_v22 = vpop.permute.xlu1 %424  ;;  %v423_v36 = vpop.permute.xlu0 %422  ;;  %v2896_v63 = vpack.c.bf16 %v1473_v55, %v1473_v55 }
 0x178   :  { %532 = vst.msk [vmem:[#allocation2 + $0xf8] sm:$0xf] %vm500_vm3, %v425_v22  ;;  %531 = vst.msk [vmem:[#allocation2 + $0xf0] sm:$0xf] %vm500_vm3, %v423_v36 }
 0x179   :  { %v1811_v8 = vmax.bf16 %v2896_v63, %v2895_v39 }
 0x17b   :  { %v437_v45 = vpop.permute.xlu1 %436  ;;  %v435_v46 = vpop.permute.xlu0 %434 }
 0x17c   :  { %538 = vst.msk [vmem:[#allocation2 + $0x128] sm:$0xf] %vm500_vm3, %v437_v45  ;;  %537 = vst.msk [vmem:[#allocation2 + $0x120] sm:$0xf] %vm500_vm3, %v435_v46 }
 0x17f   :  { %v611_v47 = vpop.permute.xlu1 %610  ;;  %v609_v48 = vpop.permute.xlu0 %608 }
 0x180   :  { %718 = vst.msk [vmem:[#allocation2 + $0xf8] sm:$0xf] %vm686_vm7, %v611_v47  ;;  %717 = vst.msk [vmem:[#allocation2 + $0xf0] sm:$0xf] %vm686_vm7, %v609_v48  ;;  %v1477_v24 = vpop.f32.mrf.mxu0 }
 0x181   :  { %999 = vst.msk [vmem:[#allocation2 + $0xf8] sm:$0xff] %vm3714_vm8, %v904_v50  ;;  %998 = vst.msk [vmem:[#allocation2 + $0xf0] sm:$0xff] %vm3714_vm8, %v903_v53  ;;  %v1478_v40 = vadd.f32 %v4175_v0, %v1477_v24 }
 0x182   :  { %v1479_v56 = vpop.f32.mrf.mxu0 }
 0x183   :  { %v623_v25 = vpop.permute.xlu1 %622  ;;  %v621_v43 = vpop.permute.xlu0 %620  ;;  %v2897_v35 = vpack.c.bf16 %v1478_v40, %v1478_v40 }
 0x184   :  { %724 = vst.msk [vmem:[#allocation2 + $0x128] sm:$0xf] %vm686_vm7, %v623_v25  ;;  %723 = vst.msk [vmem:[#allocation2 + $0x120] sm:$0xf] %vm686_vm7, %v621_v43  ;;  %v1480_v28 = vpop.f32.mrf.mxu0 }
 0x185   :  { %1005 = vst.msk [vmem:[#allocation2 + $0x128] sm:$0xff] %vm3714_vm8, %v910_v61  ;;  %1004 = vst.msk [vmem:[#allocation2 + $0x120] sm:$0xff] %vm3714_vm8, %v909_v62  ;;  %v1481_v1 = vadd.f32 %v4175_v0, %v1480_v28 }
 0x186   :  { %v1482_v4 = vpop.f32.mrf.mxu0 }
 0x187   :  { %v2898_v5 = vpack.c.bf16 %v1481_v1, %v1481_v1  ;;  %v243_v6 = vpop.permute.xlu1 %242  ;;  %v241_v7 = vpop.permute.xlu0 %240 }
 0x188   :  { %348 = vst.msk [vmem:[#allocation2 + $0x108] sm:$0xf] %vm314_vm2, %v243_v6  ;;  %347 = vst.msk [vmem:[#allocation2 + $0x100] sm:$0xf] %vm314_vm2, %v241_v7  ;;  %v3144_v27 = vld [vmem:[#allocation2 + $0xf4] ss:$8 sps:$4 sm:$0xff]  }
 0x189   :  { %v1822_v52 = vmax.bf16 %v2898_v5, %v2897_v35  ;;  %v3146_v42 = vld [vmem:[#allocation2 + $0xf0] ss:$8 sps:$4 sm:$0xff]   ;;  %2763 = vmatprep.mubr.msk.bf16.mxu0 %vm1345_vm9, %v3144_v27 }
 0x18a   :  { %1572 = vmatmul.mubr.bf16.gmra.mxu0 %v3146_v42 }
 0x18b   :  { %v1833_v9 = vmax.bf16 %v1822_v52, %v1811_v8  ;;  %v255_v10 = vpop.permute.xlu1 %254  ;;  %v253_v11 = vpop.permute.xlu0 %252 }
 0x18c   :  { %354 = vst.msk [vmem:[#allocation2 + $0x138] sm:$0xf] %vm314_vm2, %v255_v10  ;;  %353 = vst.msk [vmem:[#allocation2 + $0x130] sm:$0xf] %vm314_vm2, %v253_v11  ;;  %v3147_v58 = vld [vmem:[#allocation2 + $0x120] ss:$8 sps:$4 sm:$0xff]  }
 0x18d   :  { %v1844_v13 = vmax.bf16 %v3217_v3, %v1833_v9  ;;  %v3149_v14 = vld [vmem:[#allocation2 + $0x124] ss:$8 sps:$4 sm:$0xff]  }
 0x18e   :  { %2766 = vmatprep.mubr.msk.bf16.mxu1 %vm1345_vm9, %v3149_v14 }
 0x18f   :  { %v801_v15 = vpop.permute.xlu1 %800  ;;  %v799_v16 = vpop.permute.xlu0 %798  ;;  %1869 = vrot.lane.b32.xlu0 %v1844_v13, %s3220_s28  ;;  %1856 = vst.msk [vmem:[#allocation3 + $0xc] sm:$0xf] %vm1854_vm10, %v1844_v13  ;;  %1596 = vmatmul.mubr.bf16.vlgmr.msra.gmra.mxu1 %v3147_v58 }
 0x190   :  { %v1485_v41 = vpop.f32.mrf.mxu0  ;;  %v859_v57 = vrot.slane %v801_v15, 4  ;;  %v858_v2 = vrot.slane %v799_v16, 4 }
 0x191   :  { %v1486_v45 = vadd.f32 %v4175_v0, %v1485_v41 }
 0x192   :  { %v1487_v17 = vpop.f32.mrf.mxu0  ;;  %v906_v30 = vsel %vm872_vm6, %v859_v57, %v801_v15  ;;  %v905_v32 = vsel %vm872_vm6, %v858_v2, %v799_v16 }
 0x193   :  { %v813_v18 = vpop.permute.xlu1 %812  ;;  %v811_v12 = vpop.permute.xlu0 %810  ;;  %v2899_v24 = vpack.c.bf16 %v1486_v45, %v1486_v45 }
 0x194   :  { %v1488_v19 = vpop.f32.mrf.mxu0  ;;  %v865_v38 = vrot.slane %v813_v18, 4  ;;  %v864_v33 = vrot.slane %v811_v12, 4 }
 0x195   :  { %v1489_v22 = vadd.f32 %v4175_v0, %v1488_v19 }
 0x196   :  { %v1490_v51 = vpop.f32.mrf.mxu0  ;;  %v912_v47 = vsel %vm872_vm6, %v865_v38, %v813_v18  ;;  %v911_v48 = vsel %vm872_vm6, %v864_v33, %v811_v12 }
 0x197   :  { %v429_v20 = vpop.permute.xlu1 %428  ;;  %v427_v21 = vpop.permute.xlu0 %426  ;;  %v2900_v53 = vpack.c.bf16 %v1489_v22, %v1489_v22 }
 0x198   :  { %534 = vst.msk [vmem:[#allocation2 + $0x108] sm:$0xf] %vm500_vm3, %v429_v20  ;;  %533 = vst.msk [vmem:[#allocation2 + $0x100] sm:$0xf] %vm500_vm3, %v427_v21 }
 0x199   :  { %v1812_v43 = vmax.bf16 %v2900_v53, %v2899_v24 }
 0x19b   :  { %v441_v34 = vpop.permute.xlu1 %440  ;;  %v439_v23 = vpop.permute.xlu0 %438 }
 0x19c   :  { %540 = vst.msk [vmem:[#allocation2 + $0x138] sm:$0xf] %vm500_vm3, %v441_v34  ;;  %539 = vst.msk [vmem:[#allocation2 + $0x130] sm:$0xf] %vm500_vm3, %v439_v23 }
 0x19f   :  { %v615_v26 = vpop.permute.xlu1 %614  ;;  %v613_v29 = vpop.permute.xlu0 %612 }
 0x1a0   :  { %720 = vst.msk [vmem:[#allocation2 + $0x108] sm:$0xf] %vm686_vm7, %v615_v26  ;;  %719 = vst.msk [vmem:[#allocation2 + $0x100] sm:$0xf] %vm686_vm7, %v613_v29  ;;  %v1493_v44 = vpop.f32.mrf.mxu0 }
 0x1a1   :  { %1001 = vst.msk [vmem:[#allocation2 + $0x108] sm:$0xff] %vm3714_vm8, %v906_v30  ;;  %1000 = vst.msk [vmem:[#allocation2 + $0x100] sm:$0xff] %vm3714_vm8, %v905_v32  ;;  %v1494_v46 = vadd.f32 %v4175_v0, %v1493_v44 }
 0x1a2   :  { %v1495_v36 = vpop.f32.mrf.mxu0 }
 0x1a3   :  { %v627_v49 = vpop.permute.xlu1 %626  ;;  %v625_v31 = vpop.permute.xlu0 %624  ;;  %v2901_v55 = vpack.c.bf16 %v1494_v46, %v1494_v46 }
 0x1a4   :  { %726 = vst.msk [vmem:[#allocation2 + $0x138] sm:$0xf] %vm686_vm7, %v627_v49  ;;  %725 = vst.msk [vmem:[#allocation2 + $0x130] sm:$0xf] %vm686_vm7, %v625_v31  ;;  %v1496_v50 = vpop.f32.mrf.mxu0 }
 0x1a5   :  { %1007 = vst.msk [vmem:[#allocation2 + $0x138] sm:$0xff] %vm3714_vm8, %v912_v47  ;;  %1006 = vst.msk [vmem:[#allocation2 + $0x130] sm:$0xff] %vm3714_vm8, %v911_v48  ;;  %v1497_v37 = vadd.f32 %v4175_v0, %v1496_v50 }
 0x1a6   :  { %v1498_v54 = vpop.f32.mrf.mxu0 }
 0x1a7   :  { %v2902_v56 = vpack.c.bf16 %v1497_v37, %v1497_v37  ;;  %v247_v60 = vpop.permute.xlu1 %246  ;;  %v245_v40 = vpop.permute.xlu0 %244 }
 0x1a8   :  { %350 = vst.msk [vmem:[#allocation2 + $0x118] sm:$0xf] %vm314_vm2, %v247_v60  ;;  %349 = vst.msk [vmem:[#allocation2 + $0x110] sm:$0xf] %vm314_vm2, %v245_v40  ;;  %v3150_v25 = vld [vmem:[#allocation2 + $0x104] ss:$8 sps:$4 sm:$0xff]  }
 0x1a9   :  { %v1823_v61 = vmax.bf16 %v2902_v56, %v2901_v55  ;;  %v3152_v62 = vld [vmem:[#allocation2 + $0x100] ss:$8 sps:$4 sm:$0xff]   ;;  %2764 = vmatprep.mubr.msk.bf16.mxu0 %vm1345_vm9, %v3150_v25 }
 0x1aa   :  { %1580 = vmatmul.mubr.bf16.gmra.mxu0 %v3152_v62 }
 0x1ab   :  { %v1834_v28 = vmax.bf16 %v1823_v61, %v1812_v43  ;;  %v259_v63 = vpop.permute.xlu1 %258  ;;  %v257_v1 = vpop.permute.xlu0 %256 }
 0x1ac   :  { %356 = vst.msk [vmem:[#allocation2 + $0x148] sm:$0xf] %vm314_vm2, %v259_v63  ;;  %355 = vst.msk [vmem:[#allocation2 + $0x140] sm:$0xf] %vm314_vm2, %v257_v1  ;;  %v3153_v4 = vld [vmem:[#allocation2 + $0x134] ss:$8 sps:$4 sm:$0xff]  }
 0x1ad   :  { %v1845_v39 = vmax.bf16 %v3217_v3, %v1834_v28  ;;  %v3155_v35 = vld [vmem:[#allocation2 + $0x130] ss:$8 sps:$4 sm:$0xff]   ;;  %2767 = vmatprep.mubr.msk.bf16.mxu1 %vm1345_vm9, %v3153_v4 }
 0x1ae   :  { %1604 = vmatmul.mubr.bf16.gmra.mxu1 %v3155_v35 }
 0x1af   :  { %v805_v5 = vpop.permute.xlu1 %804  ;;  %v803_v6 = vpop.permute.xlu0 %802  ;;  %1871 = vrot.lane.b32.xlu1 %v1845_v39, %s3220_s28  ;;  %1899 = vrot.lane.b32.xlu0 %v1845_v39, %s3218_s15  ;;  %1857 = vst.msk [vmem:[#allocation3 + $0x18] sm:$0xf] %vm1854_vm10, %v1845_v39 }
 0x1b0   :  { %v1501_v7 = vpop.f32.mrf.mxu0  ;;  %v861_v14 = vrot.slane %v805_v5, 4  ;;  %v860_v15 = vrot.slane %v803_v6, 4 }
 0x1b1   :  { %v1502_v34 = vadd.f32 %v4175_v0, %v1501_v7 }
 0x1b2   :  { %v1503_v27 = vpop.f32.mrf.mxu0  ;;  %v908_v17 = vsel %vm872_vm6, %v861_v14, %v805_v5  ;;  %v907_v18 = vsel %vm872_vm6, %v860_v15, %v803_v6 }
 0x1b3   :  { %v817_v8 = vpop.permute.xlu1 %816  ;;  %v815_v52 = vpop.permute.xlu0 %814  ;;  %v2903_v44 = vpack.c.bf16 %v1502_v34, %v1502_v34 }
 0x1b4   :  { %v1504_v42 = vpop.f32.mrf.mxu0  ;;  %v867_v12 = vrot.slane %v817_v8, 4  ;;  %v866_v19 = vrot.slane %v815_v52, 4 }
 0x1b5   :  { %v1505_v20 = vadd.f32 %v4175_v0, %v1504_v42 }
 0x1b6   :  { %v1506_v9 = vpop.f32.mrf.mxu0  ;;  %v914_v26 = vsel %vm872_vm6, %v867_v12, %v817_v8  ;;  %v913_v29 = vsel %vm872_vm6, %v866_v19, %v815_v52 }
 0x1b7   :  { %v433_v10 = vpop.permute.xlu1 %432  ;;  %v431_v11 = vpop.permute.xlu0 %430  ;;  %v2904_v32 = vpack.c.bf16 %v1505_v20, %v1505_v20 }
 0x1b8   :  { %536 = vst.msk [vmem:[#allocation2 + $0x118] sm:$0xf] %vm500_vm3, %v433_v10  ;;  %535 = vst.msk [vmem:[#allocation2 + $0x110] sm:$0xf] %vm500_vm3, %v431_v11 }
 0x1b9   :  { %v1813_v31 = vmax.bf16 %v2904_v32, %v2903_v44 }
 0x1bb   :  { %v445_v58 = vpop.permute.xlu1 %444  ;;  %v443_v13 = vpop.permute.xlu0 %442 }
 0x1bc   :  { %542 = vst.msk [vmem:[#allocation2 + $0x148] sm:$0xf] %vm500_vm3, %v445_v58  ;;  %541 = vst.msk [vmem:[#allocation2 + $0x140] sm:$0xf] %vm500_vm3, %v443_v13 }
 0x1bf   :  { %v619_v16 = vpop.permute.xlu1 %618  ;;  %v617_v41 = vpop.permute.xlu0 %616 }
 0x1c0   :  { %722 = vst.msk [vmem:[#allocation2 + $0x118] sm:$0xf] %vm686_vm7, %v619_v16  ;;  %721 = vst.msk [vmem:[#allocation2 + $0x110] sm:$0xf] %vm686_vm7, %v617_v41  ;;  %v1509_v51 = vpop.f32.mrf.mxu0 }
 0x1c1   :  { %1003 = vst.msk [vmem:[#allocation2 + $0x118] sm:$0xff] %vm3714_vm8, %v908_v17  ;;  %1002 = vst.msk [vmem:[#allocation2 + $0x110] sm:$0xff] %vm3714_vm8, %v907_v18  ;;  %v1510_v23 = vadd.f32 %v4175_v0, %v1509_v51 }
 0x1c2   :  { %v1511_v21 = vpop.f32.mrf.mxu0 }
 0x1c3   :  { %v631_v57 = vpop.permute.xlu1 %630  ;;  %v629_v2 = vpop.permute.xlu0 %628  ;;  %v2905_v22 = vpack.c.bf16 %v1510_v23, %v1510_v23 }
 0x1c4   :  { %728 = vst.msk [vmem:[#allocation2 + $0x148] sm:$0xf] %vm686_vm7, %v631_v57  ;;  %727 = vst.msk [vmem:[#allocation2 + $0x140] sm:$0xf] %vm686_vm7, %v629_v2  ;;  %v1512_v30 = vpop.f32.mrf.mxu0 }
 0x1c5   :  { %1009 = vst.msk [vmem:[#allocation2 + $0x148] sm:$0xff] %vm3714_vm8, %v914_v26  ;;  %1008 = vst.msk [vmem:[#allocation2 + $0x140] sm:$0xff] %vm3714_vm8, %v913_v29  ;;  %v1513_v38 = vadd.f32 %v4175_v0, %v1512_v30 }
 0x1c6   :  { %v1514_v33 = vpop.f32.mrf.mxu0 }
 0x1c7   :  { %v2906_v36 = vpack.c.bf16 %v1513_v38, %v1513_v38  ;;  %v263_v45 = vpop.permute.xlu1 %262  ;;  %v261_v46 = vpop.permute.xlu0 %260  ;;  %v3164_v38 = vld [vmem:[%s4624_s3 + $0x78] sm:$0xff]  }
 0x1c8   :  { %358 = vst.msk [vmem:[#allocation2 + $0x158] sm:$0xf] %vm314_vm2, %v263_v45  ;;  %357 = vst.msk [vmem:[#allocation2 + $0x150] sm:$0xf] %vm314_vm2, %v261_v46  ;;  %v3156_v49 = vld [vmem:[#allocation2 + $0x114] ss:$8 sps:$4 sm:$0xff]   ;;  %2941 = vmatprep.subr.bf16.mxu1 %v3164_v38 }
 0x1c9   :  { %v1824_v47 = vmax.bf16 %v2906_v36, %v2905_v22  ;;  %v3158_v48 = vld [vmem:[#allocation2 + $0x110] ss:$8 sps:$4 sm:$0xff]   ;;  %2765 = vmatprep.mubr.msk.bf16.mxu0 %vm1345_vm9, %v3156_v49  ;;  %2942 = vmatpush3.bf16.msra.mxu1 %v3165_v59  ;;  %v3168_v49 = vld [vmem:[%s4624_s3 + $0x68] sm:$0xff]  }
 0x1ca   :  { %1588 = vmatmul.mubr.bf16.gmra.mxu0 %v3158_v48  ;;  %v3166_v22 = vld [vmem:[%s4624_s3 + $0x70] sm:$0xff]   ;;  %v3171_v48 = vld [vmem:[%s4624_s3 + $0x20] sm:$0xff]  }
 0x1cb   :  { %v1835_v50 = vmax.bf16 %v1824_v47, %v1813_v31  ;;  %v821_v53 = vpop.permute.xlu1 %820  ;;  %v819_v37 = vpop.permute.xlu0 %818  ;;  %v3167_v36 = vld [vmem:[%s4624_s3 + $0x30] sm:$0xff]   ;;  %2943 = vmatprep.subr.bf16.mxu1 %v3166_v22  ;;  %v3169_v31 = vld [vmem:[%s4624_s3 + $0x28] sm:$0xff]   ;;  %v3170_v47 = vld [vmem:[%s4624_s3 + $0x60] sm:$0xff]  }
 0x1cc   :  { %v1054_v54 = vld [vmem:[#allocation2 + $0x140] sm:$0xff]  ;;  %v1055_v24 = vld [vmem:[#allocation2 + $0x148] sm:$0xff]  ;;  %v869_v43 = vrot.slane %v821_v53, 4  ;;  %v868_v61 = vrot.slane %v819_v37, 4 }
 0x1cd   :  { %v3159_v55 = vld [vmem:[#allocation2 + $0x144] ss:$8 sps:$4 sm:$0xff]   ;;  %v1846_v56 = vmax.bf16 %v3217_v3, %v1835_v50  ;;  %v2733_v60 = vcombine.low %v1054_v54, %v1055_v24  ;;  %2944 = vmatpush3.bf16.msra.mxu1 %v3167_v36  ;;  %v3172_v50 = vld [vmem:[%s4624_s3 + $0x58] sm:$0xff]  }
 0x1ce   :  { %2768 = vmatprep.mubr.msk.bf16.mxu1 %vm1345_vm9, %v3159_v55  ;;  %v916_v4 = vsel %vm872_vm6, %v869_v43, %v821_v53  ;;  %v915_v39 = vsel %vm872_vm6, %v868_v61, %v819_v37  ;;  %2945 = vmatprep.subr.bf16.mxu1 %v3168_v49  ;;  %v3173_v53 = vld [vmem:[%s4624_s3 + $0x18] sm:$0xff]  }
 0x1cf   :  { %v449_v40 = vpop.permute.xlu1 %448  ;;  %v447_v25 = vpop.permute.xlu0 %446  ;;  %1901 = vrot.lane.b32.xlu1 %v1846_v56, %s3218_s15  ;;  %1944 = vrot.lane.b32.xlu0 %v1846_v56, %s3222_s0  ;;  %1858 = vst.msk [vmem:[#allocation3 + $0x24] sm:$0xf] %vm1854_vm10, %v1846_v56 }
 0x1d0   :  { %544 = vst.msk [vmem:[#allocation2 + $0x158] sm:$0xf] %vm500_vm3, %v449_v40  ;;  %543 = vst.msk [vmem:[#allocation2 + $0x150] sm:$0xf] %vm500_vm3, %v447_v25  ;;  %v1517_v62 = vpop.f32.mrf.mxu0  ;;  %1612 = vmatmul.mubr.bf16.gmra.mxu1 %v2733_v60  ;;  %v3175_v25 = vld [vmem:[%s4624_s3 + $0x10] sm:$0xff]  }
 0x1d1   :  { %v1518_v16 = vadd.f32 %v4175_v0, %v1517_v62  ;;  %2946 = vmatpush3.bf16.msra.mxu1 %v3169_v31 }
 0x1d2   :  { %v1519_v28 = vpop.f32.mrf.mxu0  ;;  %2947 = vmatprep.subr.bf16.mxu1 %v3170_v47 }
 0x1d3   :  { %v635_v63 = vpop.permute.xlu1 %634  ;;  %v633_v1 = vpop.permute.xlu0 %632  ;;  %1873 = vrot.lane.b32.xlu0 %v1846_v56, %s3220_s28  ;;  %v2907_v23 = vpack.c.bf16 %v1518_v16, %v1518_v16  ;;  %v3174_v56 = vld [vmem:[%s4624_s3 + $0x50] sm:$0xff]  }
 0x1d4   :  { %730 = vst.msk [vmem:[#allocation2 + $0x158] sm:$0xf] %vm686_vm7, %v635_v63  ;;  %729 = vst.msk [vmem:[#allocation2 + $0x150] sm:$0xf] %vm686_vm7, %v633_v1  ;;  %v1520_v35 = vpop.f32.mrf.mxu0 }
 0x1d5   :  { %1011 = vst.msk [vmem:[#allocation2 + $0x158] sm:$0xff] %vm3714_vm8, %v916_v4  ;;  %1010 = vst.msk [vmem:[#allocation2 + $0x150] sm:$0xff] %vm3714_vm8, %v915_v39  ;;  %v1521_v13 = vadd.f32 %v4175_v0, %v1520_v35  ;;  %2948 = vmatpush3.bf16.msra.mxu1 %v3171_v48  ;;  %v3179_v4 = vld [vmem:[%s4624_s3 + $0x48] sm:$0xff]  }
 0x1d6   :  { %v1522_v5 = vpop.f32.mrf.mxu0  ;;  %2949 = vmatprep.subr.bf16.mxu1 %v3172_v50 }
 0x1d7   :  { %v265_v6 = vpop.permute.xlu0 %264  ;;  %v267_v7 = vpop.permute.xlu1 %266  ;;  %v2908_v51 = vpack.c.bf16 %v1521_v13, %v1521_v13 }
 0x1d8   :  { %359 = vst.msk [vmem:[#allocation2 + $0x160] sm:$0xf] %vm314_vm2, %v265_v6  ;;  %360 = vst.msk [vmem:[#allocation2 + $0x168] sm:$0xf] %vm314_vm2, %v267_v7  ;;  %v3180_v6 = vld [vmem:[%s4624_s3 + $0x8] sm:$0xff]  }
 0x1d9   :  { %v1814_v26 = vmax.bf16 %v2908_v51, %v2907_v23  ;;  %2950 = vmatpush3.bf16.msra.mxu1 %v3173_v53  ;;  %vm4450_vm2 = vmor %vm2011_vm0, %vm2010_vm15 }
 0x1da   :  { %2951 = vmatprep.subr.bf16.mxu1 %v3174_v56 }
 0x1db   :  { %v823_v27 = vpop.permute.xlu0 %822  ;;  %v825_v8 = vpop.permute.xlu1 %824 }
 0x1dc   :  { %v3161_v52 = vld [vmem:[#allocation2 + $0x154] ss:$8 sps:$4 sm:$0xff]   ;;  %v3163_v42 = vld [vmem:[#allocation2 + $0x150] ss:$8 sps:$4 sm:$0xff]   ;;  %v870_v9 = vrot.slane %v823_v27, 4  ;;  %v871_v58 = vrot.slane %v825_v8, 4 }
 0x1dd   :  { %2769 = vmatprep.mubr.msk.bf16.mxu1 %vm1345_vm9, %v3161_v52  ;;  %2952 = vmatpush3.bf16.msra.mxu1 %v3175_v25 }
 0x1de   :  { %1620 = vmatmul.mubr.bf16.gmra.mxu1 %v3163_v42  ;;  %v917_v17 = vsel %vm872_vm6, %v870_v9, %v823_v27  ;;  %v918_v19 = vsel %vm872_vm6, %v871_v58, %v825_v8  ;;  %2953 = vmatprep.subr.bf16.mxu1 %v3179_v4  ;;  %v3181_v8 = vld [vmem:[%s4624_s3 + $0x40] sm:$0xff]  }
 0x1df   :  { %v1525_v10 = vpop.f32.mrf.mxu0  ;;  %v451_v11 = vpop.permute.xlu0 %450  ;;  %v3182_v42 = vld [vmem:[%s4624_s3] sm:$0xff]  }
 0x1e0   :  { %545 = vst.msk [vmem:[#allocation2 + $0x160] sm:$0xf] %vm500_vm3, %v451_v11  ;;  %v453_v14 = vpop.permute.xlu1 %452  ;;  %v1526_v41 = vadd.f32 %v4175_v0, %v1525_v10 }
 0x1e1   :  { %v1527_v15 = vpop.f32.mrf.mxu0  ;;  %546 = vst.msk [vmem:[#allocation2 + $0x168] sm:$0xf] %vm500_vm3, %v453_v14  ;;  %2954 = vmatpush3.bf16.msra.mxu1 %v3180_v6  ;;  %vm2249_vm3 = vcmask 1043456   ;;  %v3200_v6 = vld [vmem:[%s4625_s5 + $0x30] sm:$0xff]  }
 0x1e2   :  { %v2909_v57 = vpack.c.bf16 %v1526_v41, %v1526_v41  ;;  %2955 = vmatprep.subr.bf16.mxu1 %v3181_v8 }
 0x1e3   :  { %v1528_v18 = vpop.f32.mrf.mxu0  ;;  %v637_v12 = vpop.permute.xlu0 %636 }
 0x1e4   :  { %v1529_v20 = vadd.f32 %v4175_v0, %v1528_v18  ;;  %731 = vst.msk [vmem:[#allocation2 + $0x160] sm:$0xf] %vm686_vm7, %v637_v12  ;;  %v639_v21 = vpop.permute.xlu1 %638 }
 0x1e5   :  { %v1530_v34 = vpop.f32.mrf.mxu0  ;;  %1012 = vst.msk [vmem:[#allocation2 + $0x160] sm:$0xff] %vm3714_vm8, %v917_v17  ;;  %2956 = vmatpush3.bf16.msra.mxu1 %v3182_v42 }
 0x1e6   :  { %732 = vst.msk [vmem:[#allocation2 + $0x168] sm:$0xf] %vm686_vm7, %v639_v21  ;;  %v2910_v2 = vpack.c.bf16 %v1529_v20, %v1529_v20 }
 0x1e7   :  { %1013 = vst.msk [vmem:[#allocation2 + $0x168] sm:$0xff] %vm3714_vm8, %v918_v19 }
 0x1e8   :  { %v1825_v29 = vmax.bf16 %v2910_v2, %v2909_v57 }
 0x1ea   :  { %v1836_v30 = vmax.bf16 %v1825_v29, %v1814_v26 }
 0x1ec   :  { %v1847_v32 = vmax.bf16 %v3217_v3, %v1836_v30 }
 0x1ee   :  { %1946 = vrot.lane.b32.xlu1 %v1847_v32, %s3222_s0  ;;  %1974 = vrot.lane.b32.xlu0 %v1847_v32, %s3223_s24  ;;  %1859 = vst.msk [vmem:[#allocation3 + $0x30] sm:$0xf] %vm1854_vm10, %v1847_v32  ;;  %v3176_v28 = vld [vmem:[#allocation2 + $0x164] ss:$8 sps:$4 sm:$0xff]   ;;  %v3178_v1 = vld [vmem:[#allocation2 + $0x160] ss:$8 sps:$4 sm:$0xff]  }
 0x1ef   :  { %v1533_v33 = vpop.f32.mrf.mxu0  ;;  %2770 = vmatprep.mubr.msk.bf16.mxu1 %vm1345_vm9, %v3176_v28 }
 0x1f0   :  { %v1534_v60 = vadd.f32 %v4175_v0, %v1533_v33  ;;  %1628 = vmatmul.mubr.bf16.gmra.mxu1 %v3178_v1 }
 0x1f1   :  { %v1535_v44 = vpop.f32.mrf.mxu0 }
 0x1f2   :  { %1875 = vrot.lane.b32.xlu1 %v1847_v32, %s3220_s28  ;;  %1903 = vrot.lane.b32.xlu0 %v1847_v32, %s3218_s15  ;;  %v2911_v39 = vpack.c.bf16 %v1534_v60, %v1534_v60 }
 0x1f3   :  { %v1536_v45 = vpop.f32.mrf.mxu0 }
 0x1f4   :  { %v1537_v54 = vadd.f32 %v4175_v0, %v1536_v45 }
 0x1f5   :  { %v1538_v46 = vpop.f32.mrf.mxu0 }
 0x1f6   :  { %v2912_v61 = vpack.c.bf16 %v1537_v54, %v1537_v54 }
 0x1f8   :  { %v1815_v7 = vmax.bf16 %v2912_v61, %v2911_v39 }
 0x1ff   :  { %v1541_v37 = vpop.f32.mrf.mxu0 }
 0x200   :  { %v1542_v40 = vadd.f32 %v4175_v0, %v1541_v37 }
 0x201   :  { %v1870_v24 = vpop.permute.xlu0 %1869  ;;  %v1543_v55 = vpop.f32.mrf.mxu0 }
 0x202   :  { %1891 = vst.msk [vmem:[#allocation3] sm:$0xf] %vm1890_vm11, %v1870_v24  ;;  %v2913_v35 = vpack.c.bf16 %v1542_v40, %v1542_v40 }
 0x203   :  { %v1544_v43 = vpop.f32.mrf.mxu0 }
 0x204   :  { %v1545_v62 = vadd.f32 %v4175_v0, %v1544_v43 }
 0x205   :  { %v1546_v63 = vpop.f32.mrf.mxu0 }
 0x206   :  { %v2914_v5 = vpack.c.bf16 %v1545_v62, %v1545_v62 }
 0x208   :  { %v1826_v27 = vmax.bf16 %v2914_v5, %v2913_v35 }
 0x20a   :  { %v1837_v52 = vmax.bf16 %v1826_v27, %v1815_v7 }
 0x20c   :  { %v1848_v9 = vmax.bf16 %v3217_v3, %v1837_v52 }
 0x20e   :  { %1860 = vst.msk [vmem:[#allocation3 + $0x3c] sm:$0xf] %vm1854_vm10, %v1848_v9  ;;  %1976 = vrot.lane.b32.xlu1 %v1848_v9, %s3223_s24  ;;  %1948 = vrot.lane.b32.xlu0 %v1848_v9, %s3222_s0 }
 0x20f   :  { %v1549_v10 = vpop.f32.mrf.mxu0 }
 0x210   :  { %v1550_v19 = vadd.f32 %v4175_v0, %v1549_v10 }
 0x211   :  { %v1551_v11 = vpop.f32.mrf.mxu0 }
 0x212   :  { %1905 = vrot.lane.b32.xlu1 %v1848_v9, %s3218_s15  ;;  %1877 = vrot.lane.b32.xlu0 %v1848_v9, %s3220_s28  ;;  %v2915_v2 = vpack.c.bf16 %v1550_v19, %v1550_v19 }
 0x213   :  { %v1552_v58 = vpop.f32.mrf.mxu0 }
 0x214   :  { %v1553_v15 = vadd.f32 %v4175_v0, %v1552_v58 }
 0x215   :  { %v1554_v13 = vpop.f32.mrf.mxu0 }
 0x216   :  { %v2916_v34 = vpack.c.bf16 %v1553_v15, %v1553_v15 }
 0x218   :  { %v1816_v30 = vmax.bf16 %v2916_v34, %v2915_v2 }
 0x21f   :  { %v1557_v14 = vpop.f32.mrf.mxu0 }
 0x220   :  { %v1558_v51 = vadd.f32 %v4175_v0, %v1557_v14  ;;  %v4464_v14 = vld [vmem:[%s4623_s2] ss:$0 sm:$0xff] }
 0x221   :  { %v1872_v16 = vpop.permute.xlu1 %1871  ;;  %v1900_v41 = vpop.permute.xlu0 %1899 }
 0x222   :  { %1892 = vst.msk [vmem:[#allocation3 + $0xc] sm:$0xf] %vm1890_vm11, %v1872_v16  ;;  %v1913_v17 = vrot.slane %v1900_v41, 4  ;;  %v1559_v18 = vpop.f32.mrf.mxu0  ;;  %v2917_v26 = vpack.c.bf16 %v1558_v51, %v1558_v51 }
 0x224   :  { %v1920_v20 = vsel %vm872_vm6, %v1913_v17, %v1900_v41  ;;  %v1560_v21 = vpop.f32.mrf.mxu0 }
 0x225   :  { %v1561_v23 = vadd.f32 %v4175_v0, %v1560_v21  ;;  %1936 = vst.msk [vmem:[#allocation3] sm:$0xff] %vm4417_vm13, %v1920_v20 }
 0x226   :  { %v1562_v57 = vpop.f32.mrf.mxu0 }
 0x227   :  { %v2918_v29 = vpack.c.bf16 %v1561_v23, %v1561_v23 }
 0x229   :  { %v1827_v32 = vmax.bf16 %v2918_v29, %v2917_v26 }
 0x22b   :  { %v1838_v38 = vmax.bf16 %v1827_v32, %v1816_v30 }
 0x22d   :  { %v1849_v33 = vmax.bf16 %v3217_v3, %v1838_v38 }
 0x22f   :  { %1861 = vst.msk [vmem:[#allocation3 + $0x48] sm:$0xf] %vm1854_vm10, %v1849_v33  ;;  %1950 = vrot.lane.b32.xlu1 %v1849_v33, %s3222_s0  ;;  %1978 = vrot.lane.b32.xlu0 %v1849_v33, %s3223_s24  ;;  %v1565_v59 = vpop.f32.mrf.mxu0 }
 0x230   :  { %v1566_v37 = vadd.f32 %v4175_v0, %v1565_v59 }
 0x231   :  { %v1567_v44 = vpop.f32.mrf.mxu0 }
 0x232   :  { %v2919_v25 = vpack.c.bf16 %v1566_v37, %v1566_v37 }
 0x233   :  { %1879 = vrot.lane.b32.xlu1 %v1849_v33, %s3220_s28  ;;  %1907 = vrot.lane.b32.xlu0 %v1849_v33, %s3218_s15  ;;  %v1568_v22 = vpop.f32.mrf.mxu0 }
 0x234   :  { %v1569_v50 = vadd.f32 %v4175_v0, %v1568_v22 }
 0x235   :  { %v1570_v36 = vpop.f32.mrf.mxu0 }
 0x236   :  { %v2920_v55 = vpack.c.bf16 %v1569_v50, %v1569_v50 }
 0x238   :  { %v1817_v28 = vmax.bf16 %v2920_v55, %v2919_v25 }
 0x241   :  { %v1902_v45 = vpop.permute.xlu1 %1901  ;;  %v1945_v46 = vpop.permute.xlu0 %1944 }
 0x242   :  { %v1914_v49 = vrot.slane %v1902_v45, 4  ;;  %1966 = vst.msk [vmem:[#allocation3 + $0x4] sm:$0xf] %vm1965_vm14, %v1945_v46 }
 0x244   :  { %v1921_v31 = vsel %vm872_vm6, %v1914_v49, %v1902_v45 }
 0x245   :  { %1937 = vst.msk [vmem:[#allocation3 + $0xc] sm:$0xff] %vm4417_vm13, %v1921_v31  ;;  %v1874_v47 = vpop.permute.xlu0 %1873 }
 0x246   :  { %1893 = vst.msk [vmem:[#allocation3 + $0x18] sm:$0xf] %vm1890_vm11, %v1874_v47 }
 0x24a   :  { %v1573_v48 = vpop.f32.mrf.mxu0 }
 0x24b   :  { %v1574_v54 = vadd.f32 %v4175_v0, %v1573_v48 }
 0x24c   :  { %v1575_v53 = vpop.f32.mrf.mxu0  ;;  %v3183_v49 = vld [vmem:[#allocation3] ss:$12 sps:$4 sm:$0xff]  }
 0x24d   :  { %v2921_v43 = vpack.c.bf16 %v1574_v54, %v1574_v54 }
 0x24e   :  { %v1576_v24 = vpop.f32.mrf.mxu0 }
 0x24f   :  { %v1577_v56 = vadd.f32 %v4175_v0, %v1576_v24  ;;  %v1597_v60 = vpop.f32.mrf.mxu1 }
 0x250   :  { %v1578_v40 = vpop.f32.mrf.mxu0  ;;  %v1598_v17 = vadd.f32 %v4464_v14, %v1597_v60 }
 0x251   :  { %v2922_v61 = vpack.c.bf16 %v1577_v56, %v1577_v56  ;;  %v1599_v62 = vpop.f32.mrf.mxu1 }
 0x252   :  { %v2927_v34 = vpack.c.bf16 %v1598_v17, %v1598_v17 }
 0x253   :  { %v1828_v63 = vmax.bf16 %v2922_v61, %v2921_v43  ;;  %v1600_v1 = vpop.f32.mrf.mxu1 }
 0x254   :  { %v1601_v15 = vadd.f32 %v4464_v14, %v1600_v1 }
 0x255   :  { %v1839_v4 = vmax.bf16 %v1828_v63, %v1817_v28  ;;  %v1602_v39 = vpop.f32.mrf.mxu1  ;;  %v3189_v63 = vld [vmem:[%s4624_s3 + $0x88] ss:$0 sps:$4 sm:$0xff]  }
 0x256   :  { %v2928_v51 = vpack.c.bf16 %v1601_v15, %v1601_v15  ;;  %3080 = vmatprep.subr.msk.bf16.mxu1 %vm2249_vm3, %v3189_v63  ;;  %v2251_v39 = vsel %vm2249_vm3, %v3189_v63, 0 }
 0x257   :  { %v4443_v35 = vmax.bf16 %v3217_v3, %v1839_v4 }
 0x258   :  { %v1819_v2 = vmax.bf16 %v2928_v51, %v2927_v34 }
 0x259   :  { %1980 = vrot.lane.b32.xlu1 %v4443_v35, %s3223_s24  ;;  %1952 = vrot.lane.b32.xlu0 %v4443_v35, %s3222_s0 }
 0x260   :  { %v1947_v0 = vpop.permute.xlu1 %1946  ;;  %v1975_v5 = vpop.permute.xlu0 %1974 }
 0x261   :  { %1967 = vst.msk [vmem:[#allocation3 + $0x10] sm:$0xf] %vm1965_vm14, %v1947_v0  ;;  %v1988_v7 = vrot.slane %v1975_v5, 4 }
 0x263   :  { %v1996_v27 = vsel %vm1995_vm1, %v1988_v7, %v1975_v5 }
 0x264   :  { %2013 = vst.msk [vmem:[#allocation3 + $0x4] sm:$0xff] %vm4450_vm2, %v1996_v27  ;;  %v1876_v8 = vpop.permute.xlu1 %1875  ;;  %v1904_v52 = vpop.permute.xlu0 %1903 }
 0x265   :  { %1894 = vst.msk [vmem:[#allocation3 + $0x24] sm:$0xf] %vm1890_vm11, %v1876_v8  ;;  %v1915_v42 = vrot.slane %v1904_v52, 4 }
 0x267   :  { %v1922_v9 = vsel %vm872_vm6, %v1915_v42, %v1904_v52 }
 0x268   :  { %1938 = vst.msk [vmem:[#allocation3 + $0x18] sm:$0xff] %vm4417_vm13, %v1922_v9 }
 0x26a   :  { %v1581_v10 = vpop.f32.mrf.mxu0 }
 0x26b   :  { %v1582_v50 = vadd.f32 %v4464_v14, %v1581_v10 }
 0x26c   :  { %v1583_v11 = vpop.f32.mrf.mxu0 }
 0x26d   :  { %v2923_v60 = vpack.c.bf16 %v1582_v50, %v1582_v50 }
 0x26e   :  { %v1584_v58 = vpop.f32.mrf.mxu0  ;;  %v1605_v13 = vpop.f32.mrf.mxu1 }
 0x26f   :  { %v1606_v18 = vadd.f32 %v4464_v14, %v1605_v13  ;;  %v1585_v47 = vadd.f32 %v4464_v14, %v1584_v58 }
 0x270   :  { %v1586_v16 = vpop.f32.mrf.mxu0  ;;  %v1607_v41 = vpop.f32.mrf.mxu1 }
 0x271   :  { %v2929_v23 = vpack.c.bf16 %v1606_v18, %v1606_v18  ;;  %v2924_v54 = vpack.c.bf16 %v1585_v47, %v1585_v47  ;;  %v3193_v41 = vld [vmem:[%s4624_s3 + $0x80] sm:$0xff]  }
 0x272   :  { %v1608_v19 = vpop.f32.mrf.mxu1 }
 0x273   :  { %v1609_v20 = vadd.f32 %v4464_v14, %v1608_v19  ;;  %v1818_v61 = vmax.bf16 %v2924_v54, %v2923_v60 }
 0x274   :  { %v1610_v21 = vpop.f32.mrf.mxu1 }
 0x275   :  { %v2930_v57 = vpack.c.bf16 %v1609_v20, %v1609_v20 }
 0x277   :  { %v1830_v26 = vmax.bf16 %v2930_v57, %v2929_v23 }
 0x279   :  { %v1841_v29 = vmax.bf16 %v1830_v26, %v1819_v2 }
 0x27b   :  { %v1852_v30 = vmax.bf16 %v3217_v3, %v1841_v29 }
 0x27d   :  { %1984 = vrot.lane.b32.xlu1 %v1852_v30, %s3223_s24 }
 0x280   :  { %v1977_v32 = vpop.permute.xlu1 %1976  ;;  %v1949_v38 = vpop.permute.xlu0 %1948 }
 0x281   :  { %v1989_v33 = vrot.slane %v1977_v32, 4  ;;  %1968 = vst.msk [vmem:[#allocation3 + $0x1c] sm:$0xf] %vm1965_vm14, %v1949_v38  ;;  %1909 = vrot.lane.b32.xlu1 %v4443_v35, %s3218_s15 }
 0x283   :  { %v1997_v59 = vsel %vm1995_vm1, %v1989_v33, %v1977_v32 }
 0x284   :  { %2014 = vst.msk [vmem:[#allocation3 + $0x10] sm:$0xff] %vm4450_vm2, %v1997_v59  ;;  %v1906_v44 = vpop.permute.xlu1 %1905  ;;  %v1878_v22 = vpop.permute.xlu0 %1877 }
 0x285   :  { %v1916_v36 = vrot.slane %v1906_v44, 4  ;;  %1895 = vst.msk [vmem:[#allocation3 + $0x30] sm:$0xf] %vm1890_vm11, %v1878_v22 }
 0x287   :  { %v1923_v45 = vsel %vm872_vm6, %v1916_v36, %v1906_v44 }
 0x288   :  { %1939 = vst.msk [vmem:[#allocation3 + $0x24] sm:$0xff] %vm4417_vm13, %v1923_v45 }
 0x28a   :  { %v1589_v46 = vpop.f32.mrf.mxu0 }
 0x28b   :  { %v3185_v31 = vld [vmem:[#allocation3 + $0x4] ss:$12 sps:$4 sm:$0xff]   ;;  %v1590_v53 = vadd.f32 %v4464_v14, %v1589_v46  ;;  %v3196_v12 = vld [vmem:[#allocation3 + $0x8] ss:$12 sps:$4 sm:$0xff]  }
 0x28c   :  { %v1591_v48 = vpop.f32.mrf.mxu0  ;;  %2285 = vmatprep.mubr.bf16.mxu1 %v3185_v31 }
 0x28d   :  { %2286 = vmatmul.mubr.bf16.vlgmr.msra.gmra.mxu1 %v3183_v49  ;;  %v2925_v40 = vpack.c.bf16 %v1590_v53, %v1590_v53 }
 0x28e   :  { %v1592_v37 = vpop.f32.mrf.mxu0  ;;  %3007 = vmatpush3.bf16.msra.mxu1 %v2251_v39 }
 0x28f   :  { %v1593_v24 = vadd.f32 %v4464_v14, %v1592_v37  ;;  %3008 = vmatprep.subr.bf16.mxu1 %v3193_v41  ;;  %v3188_v22 = vld [vmem:[#allocation3 + $0x18] ss:$12 sps:$4 sm:$0xff]  }
 0x290   :  { %v1613_v55 = vpop.f32.mrf.mxu1  ;;  %v1594_v56 = vpop.f32.mrf.mxu0 }
 0x291   :  { %v2926_v25 = vpack.c.bf16 %v1593_v24, %v1593_v24  ;;  %v1614_v9 = vadd.f32 %v4464_v14, %v1613_v55 }
 0x292   :  { %v1615_v43 = vpop.f32.mrf.mxu1  ;;  %3009 = vmatpush3.bf16.msra.mxu1 %v3193_v41 }
 0x293   :  { %v1829_v62 = vmax.bf16 %v2926_v25, %v2925_v40  ;;  %v2931_v19 = vpack.c.bf16 %v1614_v9, %v1614_v9  ;;  %v3206_v9 = vld [vmem:[%s4625_s5] sm:$0xff]  }
 0x294   :  { %v1616_v28 = vpop.f32.mrf.mxu1 }
 0x295   :  { %v1840_v1 = vmax.bf16 %v1829_v62, %v1818_v61  ;;  %v1617_v7 = vadd.f32 %v4464_v14, %v1616_v28 }
 0x296   :  { %v1618_v4 = vpop.f32.mrf.mxu1 }
 0x297   :  { %v1851_v0 = vmax.bf16 %v3217_v3, %v1840_v1  ;;  %v2932_v58 = vpack.c.bf16 %v1617_v7, %v1617_v7  ;;  %v3201_v7 = vld [vmem:[%s4625_s5 + $0x28] sm:$0xff]  }
 0x299   :  { %1954 = vrot.lane.b32.xlu1 %v1851_v0, %s3222_s0  ;;  %1982 = vrot.lane.b32.xlu0 %v1851_v0, %s3223_s24  ;;  %v1820_v34 = vmax.bf16 %v2932_v58, %v2931_v19 }
 0x29d   :  { %1881 = vrot.lane.b32.xlu1 %v4443_v35, %s3220_s28  ;;  %1911 = vrot.lane.b32.xlu0 %v1851_v0, %s3218_s15 }
 0x29e   :  { %v1621_v5 = vpop.f32.mrf.mxu1 }
 0x29f   :  { %v1622_v10 = vadd.f32 %v4464_v14, %v1621_v5  ;;  %v3224_v5 = vmov 0.0  }
 0x2a0   :  { %v1623_v42 = vpop.f32.mrf.mxu1  ;;  %3018 = vmatprep.subr.bf16.mxu1 %v3224_v5 }
 0x2a1   :  { %v1951_v27 = vpop.permute.xlu1 %1950  ;;  %v1979_v8 = vpop.permute.xlu0 %1978  ;;  %1956 = vrot.lane.b32.xlu1 %v1852_v30, %s3222_s0  ;;  %v2933_v51 = vpack.c.bf16 %v1622_v10, %v1622_v10  ;;  %v3205_v42 = vld [vmem:[%s4625_s5 + $0x8] sm:$0xff]  }
 0x2a2   :  { %1969 = vst.msk [vmem:[#allocation3 + $0x28] sm:$0xf] %vm1965_vm14, %v1951_v27  ;;  %v1990_v52 = vrot.slane %v1979_v8, 4  ;;  %v1624_v35 = vpop.f32.mrf.mxu1  ;;  %v3202_v27 = vld [vmem:[%s4625_s5 + $0x20] sm:$0xff]  }
 0x2a3   :  { %v1625_v13 = vadd.f32 %v4464_v14, %v1624_v35 }
 0x2a4   :  { %v1998_v11 = vsel %vm1995_vm1, %v1990_v52, %v1979_v8  ;;  %v1626_v18 = vpop.f32.mrf.mxu1  ;;  %v3203_v8 = vld [vmem:[%s4625_s5 + $0x18] sm:$0xff]   ;;  %v3204_v52 = vld [vmem:[%s4625_s5 + $0x10] sm:$0xff]  }
 0x2a5   :  { %2015 = vst.msk [vmem:[#allocation3 + $0x1c] sm:$0xff] %vm4450_vm2, %v1998_v11  ;;  %v1880_v15 = vpop.permute.xlu1 %1879  ;;  %v1908_v16 = vpop.permute.xlu0 %1907  ;;  %v2934_v20 = vpack.c.bf16 %v1625_v13, %v1625_v13 }
 0x2a6   :  { %1896 = vst.msk [vmem:[#allocation3 + $0x3c] sm:$0xf] %vm1890_vm11, %v1880_v15  ;;  %v1917_v17 = vrot.slane %v1908_v16, 4 }
 0x2a7   :  { %v1831_v23 = vmax.bf16 %v2934_v20, %v2933_v51 }
 0x2a8   :  { %v1924_v21 = vsel %vm872_vm6, %v1917_v17, %v1908_v16 }
 0x2a9   :  { %1940 = vst.msk [vmem:[#allocation3 + $0x30] sm:$0xff] %vm4417_vm13, %v1924_v21  ;;  %v1842_v14 = vmax.bf16 %v1831_v23, %v1820_v34 }
 0x2ab   :  { %v1853_v57 = vmax.bf16 %v3217_v3, %v1842_v14 }
 0x2ad   :  { %1986 = vrot.lane.b32.xlu0 %v1853_v57, %s3223_s24  ;;  %v2815_v57 = vld [vmem:[%s4626_s4] ss:$0 sm:$0xff] }
 0x2b0   :  { %v1629_v2 = vpop.f32.mrf.mxu1 }
 0x2b2   :  { %v1630_v26 = vpop.f32.mrf.mxu1 }
 0x2b4   :  { %v1631_v29 = vpop.f32.mrf.mxu1 }
 0x2b6   :  { %v1632_v33 = vpop.f32.mrf.mxu1 }
 0x2cb   :  { %v1981_v30 = vpop.permute.xlu1 %1980  ;;  %v1953_v32 = vpop.permute.xlu0 %1952 }
 0x2cc   :  { %v1991_v38 = vrot.slane %v1981_v30, 4  ;;  %1970 = vst.msk [vmem:[#allocation3 + $0x34] sm:$0xf] %vm1965_vm14, %v1953_v32 }
 0x2ce   :  { %v1999_v59 = vsel %vm1995_vm1, %v1991_v38, %v1981_v30 }
 0x2cf   :  { %2016 = vst.msk [vmem:[#allocation3 + $0x28] sm:$0xff] %vm4450_vm2, %v1999_v59 }
 0x2d6   :  { %v3186_v44 = vld [vmem:[#allocation3 + $0x1c] ss:$12 sps:$4 sm:$0xff]   ;;  %v3197_v4 = vld [vmem:[#allocation3 + $0x20] ss:$12 sps:$4 sm:$0xff]  }
 0x2d7   :  { %2293 = vmatprep.mubr.bf16.mxu1 %v3186_v44 }
 0x2d8   :  { %2294 = vmatmul.mubr.bf16.gmra.mxu1 %v3188_v22 }
 0x2ef   :  { %v1985_v36 = vpop.permute.xlu1 %1984 }
 0x2f0   :  { %v1993_v31 = vrot.slane %v1985_v36, 4 }
 0x2f2   :  { %v2001_v50 = vsel %vm1995_vm1, %v1993_v31, %v1985_v36 }
 0x2f3   :  { %v1910_v45 = vpop.permute.xlu1 %1909 }
 0x2f4   :  { %v1918_v46 = vrot.slane %v1910_v45, 4 }
 0x2f6   :  { %v1925_v49 = vsel %vm872_vm6, %v1918_v46, %v1910_v45 }
 0x2f7   :  { %1941 = vst.msk [vmem:[#allocation3 + $0x3c] sm:$0xff] %vm4417_vm13, %v1925_v49 }
 0x2fe   :  { %v3192_v25 = vld [vmem:[#allocation3 + $0x30] ss:$12 sps:$4 sm:$0xff]  }
 0x30b   :  { %v1955_v47 = vpop.permute.xlu1 %1954  ;;  %v1983_v48 = vpop.permute.xlu0 %1982 }
 0x30c   :  { %1971 = vst.msk [vmem:[#allocation3 + $0x40] sm:$0xf] %vm1965_vm14, %v1955_v47  ;;  %v1992_v53 = vrot.slane %v1983_v48, 4 }
 0x30d   :  { %2018 = vst.msk [vmem:[#allocation3 + $0x40] sm:$0xff] %vm4450_vm2, %v2001_v50 }
 0x30e   :  { %v2000_v37 = vsel %vm1995_vm1, %v1992_v53, %v1983_v48 }
 0x30f   :  { %2017 = vst.msk [vmem:[#allocation3 + $0x34] sm:$0xff] %vm4450_vm2, %v2000_v37  ;;  %v1882_v54 = vpop.permute.xlu1 %1881  ;;  %v1912_v24 = vpop.permute.xlu0 %1911 }
 0x310   :  { %1897 = vst.msk [vmem:[#allocation3 + $0x48] sm:$0xf] %vm1890_vm11, %v1882_v54  ;;  %v1919_v55 = vrot.slane %v1912_v24, 4  ;;  %v3207_v54 = vld [vmem:[%s4625_s5 + $0x68] sm:$0xff]  }
 0x312   :  { %v1926_v56 = vsel %vm872_vm6, %v1919_v55, %v1912_v24  ;;  %v3208_v55 = vld [vmem:[%s4625_s5 + $0x60] sm:$0xff]  }
 0x313   :  { %1942 = vst.msk [vmem:[#allocation3 + $0x48] sm:$0xff] %vm4417_vm13, %v1926_v56  ;;  %v1957_v60 = vpop.permute.xlu1 %1956  ;;  %v3209_v56 = vld [vmem:[%s4625_s5 + $0x58] sm:$0xff]  }
 0x314   :  { %1972 = vst.msk [vmem:[#allocation3 + $0x4c] sm:$0xf] %vm1965_vm14, %v1957_v60 }
 0x316   :  { %v3190_v40 = vld [vmem:[#allocation3 + $0x34] ss:$12 sps:$4 sm:$0xff]   ;;  %v3198_v39 = vld [vmem:[#allocation3 + $0x38] ss:$12 sps:$4 sm:$0xff]  }
 0x317   :  { %2301 = vmatprep.mubr.bf16.mxu1 %v3190_v40 }
 0x318   :  { %2302 = vmatmul.mubr.bf16.gmra.mxu1 %v3192_v25 }
 0x31f   :  { %v1987_v43 = vpop.permute.xlu0 %1986 }
 0x320   :  { %v1994_v61 = vrot.slane %v1987_v43, 4 }
 0x322   :  { %v2002_v62 = vsel %vm1995_vm1, %v1994_v61, %v1987_v43  ;;  %v3210_v43 = vld [vmem:[%s4625_s5 + $0x50] sm:$0xff]  }
 0x323   :  { %2019 = vst.msk [vmem:[#allocation3 + $0x4c] sm:$0xff] %vm4450_vm2, %v2002_v62 }
 0x32a   :  { %v2032_v28 = vld [vmem:[#allocation3 + $0x48] sm:$0xff]  ;;  %v3199_v0 = vld [vmem:[#allocation3 + $0x50] ss:$0 sps:$4 sm:$0xff]  }
 0x32b   :  { %v2826_v63 = vcombine.high %v2032_v28, %v2032_v28  ;;  %v2825_v1 = vcombine.low %v2032_v28, %v2032_v28 }
 0x32d   :  { %2309 = vmatprep.mubr.bf16.mxu1 %v2826_v63 }
 0x32e   :  { %2310 = vmatmul.mubr.bf16.gmra.mxu1 %v2825_v1 }
 0x32f   :  { %3010 = vmatprep.mubr.msk.bf16.mxu1 %vm2236_vm4, %v3196_v12  ;;  %v3211_v12 = vld [vmem:[%s4625_s5 + $0x48] sm:$0xff]  }
 0x336   :  { %3011 = vmatmul.mubr.msk.bf16.vlgmr.msra.gmra.mxu1 %vm2236_vm4, %v3197_v4 }
 0x337   :  { %3014 = vmatprep.mubr.msk.bf16.mxu1 %vm2236_vm4, %v3198_v39  ;;  %3019 = vmatpush3.bf16.msra.mxu1 %v3200_v6  ;;  %v3212_v6 = vld [vmem:[%s4625_s5 + $0x40] sm:$0xff]  }
 0x338   :  { %3020 = vmatprep.subr.bf16.mxu1 %v3224_v5 }
 0x33b   :  { %3021 = vmatpush3.bf16.msra.mxu1 %v3201_v7 }
 0x33c   :  { %3022 = vmatprep.subr.bf16.mxu1 %v3224_v5 }
 0x33e   :  { %3015 = vmatmul.mubr.msk.bf16.gmra.mxu1 %vm2236_vm4, %v3199_v0 }
 0x33f   :  { %3023 = vmatpush3.bf16.msra.mxu1 %v3202_v27  ;;  %3032 = vmatprep.mubr.msk.bf16.mxu1 %vm3225_vm5, %v3224_v5 }
 0x340   :  { %3024 = vmatprep.subr.bf16.mxu1 %v3224_v5 }
 0x343   :  { %3025 = vmatpush3.bf16.msra.mxu1 %v3203_v8 }
 0x344   :  { %3026 = vmatprep.subr.bf16.mxu1 %v3224_v5 }
 0x347   :  { %3027 = vmatpush3.bf16.msra.mxu1 %v3204_v52  ;;  %v3213_v52 = vld [vmem:[%s4625_s5 + $0x38] sm:$0xff]  }
 0x348   :  { %3028 = vmatprep.subr.bf16.mxu1 %v3224_v5 }
 0x34b   :  { %3029 = vmatpush3.bf16.msra.mxu1 %v3205_v42 }
 0x34c   :  { %3030 = vmatprep.subr.bf16.mxu1 %v3224_v5 }
 0x34d   :  { %v2957_v10 = vpop.f32.mrf.mxu1 }
 0x34f   :  { %3031 = vmatpush3.bf16.msra.mxu1 %v3206_v9  ;;  %v2958_v11 = vpop.f32.mrf.mxu1 }
 0x350   :  { %3036 = vmatprep.subr.bf16.mxu1 %v3224_v5  ;;  %v2959_v14 = vadd.f32 %v2958_v11, %v2957_v10  ;;  %v3214_v10 = vld [vmem:[%s4627_s7 + $0x8] sm:$0xff]   ;;  %v3215_v11 = vld [vmem:[%s4627_s7] sm:$0xff]  }
 0x351   :  { %v2960_v35 = vpop.f32.mrf.mxu1 }
 0x352   :  { %v2288_v32 = vadd.f32 %v2959_v14, %v2815_v57 }
 0x353   :  { %v2961_v58 = vpop.f32.mrf.mxu1 }
 0x354   :  { %v2962_v26 = vadd.f32 %v2961_v58, %v2960_v35 }
 0x356   :  { %v2291_v44 = vadd.f32 %v2962_v26, %v2815_v57 }
 0x398   :  { %v2963_v13 = vpop.f32.mrf.mxu1 }
 0x39a   :  { %v2964_v15 = vpop.f32.mrf.mxu1 }
 0x39b   :  { %v2965_v29 = vadd.f32 %v2964_v15, %v2963_v13  ;;  %v2864_v15 = vld [vmem:[%s4628_s6] ss:$0 sm:$0xff] }
 0x39c   :  { %v2966_v16 = vpop.f32.mrf.mxu1 }
 0x39d   :  { %v2296_v33 = vadd.f32 %v2965_v29, %v2815_v57 }
 0x39e   :  { %v2967_v41 = vpop.f32.mrf.mxu1 }
 0x39f   :  { %v2968_v40 = vadd.f32 %v2967_v41, %v2966_v16 }
 0x3a1   :  { %v2299_v28 = vadd.f32 %v2968_v40, %v2815_v57 }
 0x3d8   :  { %v2969_v17 = vpop.f32.mrf.mxu1 }
 0x3da   :  { %v2970_v18 = vpop.f32.mrf.mxu1 }
 0x3db   :  { %v2971_v60 = vadd.f32 %v2970_v18, %v2969_v17 }
 0x3dc   :  { %v2972_v19 = vpop.f32.mrf.mxu1 }
 0x3dd   :  { %v2304_v61 = vadd.f32 %v2971_v60, %v2815_v57 }
 0x3de   :  { %v2973_v51 = vpop.f32.mrf.mxu1 }
 0x3df   :  { %v2974_v25 = vadd.f32 %v2973_v51, %v2972_v19 }
 0x3e1   :  { %v2307_v1 = vadd.f32 %v2974_v25, %v2815_v57 }
 0x3ee   :  { %v2975_v20 = vpop.f32.mrf.mxu1 }
 0x3f0   :  { %v2976_v21 = vpop.f32.mrf.mxu1 }
 0x3f1   :  { %v2887_v21 = vld [vmem:[%s4629_s8] ss:$0 sm:$0xff] }
 0x3f2   :  { %v2978_v34 = vpop.f32.mrf.mxu1 }
 0x3f4   :  { %v2979_v23 = vpop.f32.mrf.mxu1 }
 0x3f6   :  { %v3012_v2 = vpop.f32.mrf.mxu1 }
 0x3f7   :  { %v2359_v36 = vadd.f32 %v3012_v2, %v2296_v33 }
 0x3f8   :  { %v2350_v30 = vpop.f32.mrf.mxu1 }
 0x3f9   :  { %v2351_v59 = vadd.f32 %v2350_v30, %v2288_v32  ;;  %v2937_v48 = vpack.c.bf16 %v2359_v36, %v2359_v36 }
 0x3fa   :  { %v3013_v38 = vpop.f32.mrf.mxu1 }
 0x3fb   :  { %v2935_v49 = vpack.c.bf16 %v2351_v59, %v2351_v59  ;;  %v2362_v4 = vadd.f32 %v3013_v38, %v2299_v28 }
 0x3fc   :  { %v2353_v22 = vpop.f32.mrf.mxu1 }
 0x3fd   :  { %v2354_v45 = vadd.f32 %v2353_v22, %v2291_v44  ;;  %v2938_v7 = vpack.c.bf16 %v2362_v4, %v2362_v4 }
 0x3fe   :  { %v3016_v46 = vpop.f32.mrf.mxu1 }
 0x3ff   :  { %v2936_v31 = vpack.c.bf16 %v2354_v45, %v2354_v45 }
 0x400   :  { %v2366_v47 = vpop.f32.mrf.mxu1 }
 0x401   :  { %v2403_v50 = vmax.bf16 %v2936_v31, %v2935_v49  ;;  %v2367_v63 = vadd.f32 %v2366_v47, %v2304_v61 }
 0x402   :  { %v3017_v53 = vpop.f32.mrf.mxu1 }
 0x403   :  { %v2404_v37 = vmax.bf16 %v2937_v48, %v2403_v50  ;;  %v2939_v0 = vpack.c.bf16 %v2367_v63, %v2367_v63 }
 0x404   :  { %v2369_v62 = vpop.f32.mrf.mxu1 }
 0x405   :  { %v2405_v24 = vmax.bf16 %v3217_v3, %v2404_v37  ;;  %v2370_v39 = vadd.f32 %v2369_v62, %v2307_v1  ;;  %v2406_v8 = vmax.bf16 %v2939_v0, %v2938_v7 }
 0x407   :  { %3033 = vmatmul.mubr.msk.bf16.vlgmr.msra.gmra.mxu1 %vm872_vm6, %v2405_v24  ;;  %v2940_v27 = vpack.c.bf16 %v2370_v39, %v2370_v39 }
 0x408   :  { %3037 = vmatpush3.bf16.msra.mxu1 %v3207_v54  ;;  %3050 = vmatprep.mubr.msk.bf16.mxu1 %vm3225_vm5, %v3224_v5 }
 0x409   :  { %3038 = vmatprep.subr.bf16.mxu1 %v3224_v5  ;;  %v2407_v42 = vmax.bf16 %v2940_v27, %v2406_v8 }
 0x40b   :  { %v2408_v9 = vmax.bf16 %v3217_v3, %v2407_v42 }
 0x40c   :  { %3039 = vmatpush3.bf16.msra.mxu1 %v3208_v55 }
 0x40d   :  { %3040 = vmatprep.subr.bf16.mxu1 %v3224_v5 }
 0x410   :  { %3041 = vmatpush3.bf16.msra.mxu1 %v3209_v56 }
 0x411   :  { %3042 = vmatprep.subr.bf16.mxu1 %v3224_v5 }
 0x414   :  { %3043 = vmatpush3.bf16.msra.mxu1 %v3210_v43 }
 0x415   :  { %3044 = vmatprep.subr.bf16.mxu1 %v3224_v5 }
 0x418   :  { %3045 = vmatpush3.bf16.msra.mxu1 %v3211_v12 }
 0x419   :  { %3046 = vmatprep.subr.bf16.mxu1 %v3224_v5 }
 0x41c   :  { %3047 = vmatpush3.bf16.msra.mxu1 %v3212_v6 }
 0x41d   :  { %3048 = vmatprep.subr.bf16.mxu1 %v3224_v5 }
 0x420   :  { %3049 = vmatpush3.bf16.msra.mxu1 %v3213_v52 }
 0x421   :  { %3054 = vmatprep.subr.bf16.mxu1 %v3224_v5 }
 0x423   :  { %3051 = vmatmul.mubr.msk.bf16.vlgmr.msra.gmra.mxu1 %vm872_vm6, %v2408_v9  ;;  %vm2643_vm6 = vcmask 261120  }
 0x424   :  { %3058 = vmatprep.mubr.msk.bf16.mxu1 %vm3225_vm5, %v3224_v5  ;;  %3055 = vmatpush3.bf16.msra.mxu1 %v3214_v10 }
 0x425   :  { %3056 = vmatprep.subr.bf16.mxu1 %v3224_v5 }
 0x428   :  { %3057 = vmatpush3.bf16.msra.mxu1 %v3215_v11 }
 0x4c7   :  { %v2504_v3 = vpop.f32.mrf.mxu1 }
 0x4c8   :  { %v2516_v16 = vadd.f32 %v2864_v15, %v2504_v3 }
 0x4c9   :  { %v3034_v35 = vpop.f32.mrf.mxu1 }
 0x4cb   :  { %v2507_v58 = vpop.f32.mrf.mxu1 }
 0x4cd   :  { %v3035_v13 = vpop.f32.mrf.mxu1 }
 0x4e3   :  { %v2611_v41 = vpop.f32.mrf.mxu1 }
 0x4e4   :  { %v2617_v17 = vadd.f32 %v2611_v41, %v2516_v16 }
 0x4e5   :  { %v3052_v18 = vpop.f32.mrf.mxu1 }
 0x4e6   :  { %v2618_v19 = vmax.f32 %v2617_v17, 0.0 }
 0x4e7   :  { %v2614_v51 = vpop.f32.mrf.mxu1 }
 0x4e8   :  { %v2619_v5 = vpack.c.bf16 %v2618_v19, %v2618_v19 }
 0x4e9   :  { %v3053_v20 = vpop.f32.mrf.mxu1 }
 0x4ea   :  { %3059 = vmatmul.mubr.msk.bf16.vlgmr.msra.gmra.mxu1 %vm2643_vm6, %v2619_v5 }
 0x5aa   :  { %v2681_v34 = vpop.f32.mrf.mxu1 }
 0x5ab   :  { %v2682_v23 = vadd.f32 %v2887_v21, %v2681_v34 }
 0x5ac   :  { %v3060_v14 = vpop.f32.mrf.mxu1 }
 0x5ad   :  { %2687 = vst [vmem:[%s4630_s9] sm:$0xff] %v2682_v23 }
 0x5ae   :  { %v2684_v57 = vpop.f32.mrf.mxu1 }
 0x5b0   :  { %v3061_v2 = vpop.f32.mrf.mxu1 }

</bundles_post_ra>
